<compile_context>
chip_gen: v5e
topology: v5e:2x2
jax: 0.10.0
libtpu: 0.0.40
codegen_flags: <defaults>
</compile_context>

<pallas_src>
import functools

import jax
import jax.numpy as jnp
from jax import lax
from jax.experimental import pallas as pl
from jax.experimental.pallas import tpu as pltpu


def _pick_rows_per_block(gh, gw, target_rows):
    """Patch-rows per grid step: must divide gh; prefer 16/8-aligned output rows."""
    target_r = max(1, min(gh, target_rows // max(gw, 1)))
    divisors = [r for r in range(target_r, 0, -1) if gh % r == 0]
    for ok in (lambda m: m % 16 == 0, lambda m: m % 8 == 0, lambda m: True):
        for r in divisors:
            if ok(r * gw):
                return r
    return gh


def _patch_embed_kernel(x_ref, w_ref, b_ref, o_ref, xt_ref, *,
                        C, R, ph, pw, gw, compute_dtype):
    """One grid step = one batch element x R patch-rows.

    x_ref : (1, C, R, ph, W) f32   raw input strip (W = gw * pw)
    w_ref : (K, N)           bf16  K ordered as (j, c, i)
    b_ref : (1, N)           f32
    o_ref : (1, R*gw, N)     out dtype
    xt_ref: (W, C*ph)        f32   VMEM scratch (transposed strip, one patch-row)
    """
    for rr in range(R):
        # Reshuffle step 1: per-channel 2-D transpose of the (ph, W) slab into
        # the scratch -> xt[w, c*ph + i] = x[c, rr*ph + i, w].
        for c in range(C):
            xt_ref[:, c * ph:(c + 1) * ph] = x_ref[0, c, rr, :, :].T
        # Reshuffle step 2: de-interleave the pixel column w = col*pw + j with
        # sublane-strided reads; lane-concat builds the (gw, K) patch matrix
        # with k = j*(C*ph) + c*ph + i (weights are pre-arranged to match).
        parts = [xt_ref[pl.ds(j, gw, stride=pw), :] for j in range(pw)]
        patches = jnp.concatenate(parts, axis=1).astype(compute_dtype)
        acc = jnp.dot(patches, w_ref[...], preferred_element_type=jnp.float32)
        o_ref[0, pl.ds(rr * gw, gw), :] = (acc + b_ref[...]).astype(o_ref.dtype)


def patch_embed_forward(x, weight, bias, patch_size, *,
                        compute_dtype=jnp.bfloat16,
                        out_dtype=jnp.bfloat16,
                        block_rows=1024):
    """PatchEmbed.forward: x (B, C, H, W) -> (B, num_patches, embed_dim)."""
    B, C, H, W = x.shape
    ph, pw = patch_size
    N = weight.shape[0]
    assert H % ph == 0 and W % pw == 0, "image size must match the patch grid"
    gh, gw = H // ph, W // pw
    num_patches = gh * gw
    K = C * ph * pw

    R = _pick_rows_per_block(gh, gw, block_rows)
    n_row_blocks = gh // R

    # Transpose-free (metadata-only) reshape so a patch-row strip is rectangular.
    x5 = x.reshape(B, C, gh, ph, W)
    # Weight (N, C, ph, pw) -> (K, N), k ordered (j, c, i); tiny one-time host op.
    w_mat = jnp.transpose(weight, (3, 1, 2, 0)).reshape(K, N).astype(compute_dtype)
    b_row = bias.reshape(1, N).astype(jnp.float32)

    out_dtype = jnp.dtype(out_dtype)
    kernel = functools.partial(
        _patch_embed_kernel, C=C, R=R, ph=ph, pw=pw, gw=gw,
        compute_dtype=jnp.dtype(compute_dtype))

    cost = pl.CostEstimate(
        flops=2 * B * num_patches * K * N,
        transcendentals=0,
        bytes_accessed=(x.size * x.dtype.itemsize                      # x, read once
                        + K * N * jnp.dtype(compute_dtype).itemsize    # weights
                        + N * 4                                        # bias
                        + B * num_patches * N * out_dtype.itemsize))   # output

    out = pl.pallas_call(
        kernel,
        out_shape=jax.ShapeDtypeStruct((B, num_patches, N), out_dtype),
        grid_spec=pltpu.PrefetchScalarGridSpec(
            num_scalar_prefetch=0,
            grid=(B, n_row_blocks),
            in_specs=[
                pl.BlockSpec((1, C, R, ph, W), lambda b, r: (b, 0, r, 0, 0)),
                pl.BlockSpec((K, N), lambda b, r: (0, 0),
                             pipeline_mode=pl.Buffered(1)),   # resident weights
                pl.BlockSpec((1, N), lambda b, r: (0, 0),
                             pipeline_mode=pl.Buffered(1)),   # resident bias
            ],
            out_specs=pl.BlockSpec((1, R * gw, N), lambda b, r: (b, r, 0)),
            scratch_shapes=[pltpu.VMEM((W, C * ph), jnp.float32)],
        ),
        compiler_params=pltpu.CompilerParams(
            # Disjoint output blocks on both axes -> shard across v7x's 2 TCs.
            dimension_semantics=("parallel", "parallel"),
            # No vmem_limit override: working set is a few MiB on all gens.
        ),
        cost_estimate=cost,
    )(x5, w_mat, b_row)
    return out


if __name__ == "__main__":
    # Small deterministic config consistent with the module:
    # img_size=(32, 32), patch_size=(8, 8), in_chans=4, embed_dim=32, batch=2.
    B, C, H, W = 2, 4, 32, 32
    ph, pw = 8, 8
    embed_dim = 32
    num_patches = (H // ph) * (W // pw)

    key = jax.random.PRNGKey(0)
    kx, kw, kb = jax.random.split(key, 3)
    x = jax.random.normal(kx, (B, C, H, W), dtype=jnp.float32)
    weight = jax.random.normal(kw, (embed_dim, C, ph, pw), dtype=jnp.float32) * 0.02
    bias = jax.random.normal(kb, (embed_dim,), dtype=jnp.float32) * 0.02

    fwd = jax.jit(functools.partial(patch_embed_forward, patch_size=(ph, pw)))
    out = jax.block_until_ready(fwd(x, weight, bias))
    assert out.shape == (B, num_patches, embed_dim), out.shape
    assert out.dtype == jnp.bfloat16, out.dtype

    # Reference: plain strided conv on bf16-rounded inputs (matches the MXU path).
    xq = x.astype(jnp.bfloat16).astype(jnp.float32)
    wq = weight.astype(jnp.bfloat16).astype(jnp.float32)
    ref = lax.conv_general_dilated(
        xq, wq, window_strides=(ph, pw), padding="VALID",
        dimension_numbers=("NCHW", "OIHW", "NCHW"))
    ref = ref + bias.reshape(1, embed_dim, 1, 1)
    ref = ref.reshape(B, embed_dim, num_patches).transpose(0, 2, 1)

    out_f32 = out.astype(jnp.float32)
    err = float(jnp.max(jnp.abs(out_f32 - ref)))
    assert jnp.allclose(out_f32, ref, atol=2e-2, rtol=2e-2), err

    print("KERNEL_OK")
</pallas_src>

<mosaic_0001>
module attributes {stable_mosaic.version = 11 : i64} {
  func.func @_patch_embed_kernel(%arg0: i32, %arg1: i32, %arg2: memref<1x4x4x8x32xf32, #tpu.memory_space<vmem>>, %arg3: memref<256x32xbf16, #tpu.memory_space<vmem>>, %arg4: memref<1x32xf32, #tpu.memory_space<vmem>>, %arg5: memref<1x16x32xbf16, #tpu.memory_space<vmem>>, %arg6: memref<32x32xf32, #tpu.memory_space<vmem>>) attributes {dimension_semantics = [#tpu.dimension_semantics<parallel>, #tpu.dimension_semantics<parallel>], iteration_bounds = array<i64: 2, 1>, scalar_prefetch = 0 : i64, scratch_operands = 1 : i64, tpu.core_type = #tpu.core_type<tc>, window_params = [{transform_indices = @transform_0, window_bounds = array<i64: 1, 4, 4, 8, 32>}, {pipeline_mode = #tpu.pipeline_mode<synchronous>, transform_indices = @transform_1, window_bounds = array<i64: 256, 32>}, {pipeline_mode = #tpu.pipeline_mode<synchronous>, transform_indices = @transform_2, window_bounds = array<i64: 1, 32>}, {transform_indices = @transform_3, window_bounds = array<i64: 1, 16, 32>}]} {
    %c0 = arith.constant 0 : index
    %c0_0 = arith.constant 0 : index
    %c0_1 = arith.constant 0 : index
    %c0_2 = arith.constant 0 : index
    %c0_3 = arith.constant 0 : index
    %0 = vector.load %arg2[%c0, %c0_0, %c0_1, %c0_2, %c0_3] : memref<1x4x4x8x32xf32, #tpu.memory_space<vmem>>, vector<1x1x1x8x32xf32>
    %1 = vector.shape_cast %0 : vector<1x1x1x8x32xf32> to vector<8x32xf32>
    %2 = tpu.transpose %1, [1, 0] : vector<8x32xf32> -> vector<32x8xf32>
    %c0_4 = arith.constant 0 : index
    %c0_5 = arith.constant 0 : index
    %3 = vector.load %arg6[%c0_4, %c0_5] : memref<32x32xf32, #tpu.memory_space<vmem>>, vector<32x8xf32>
    tpu.vector_store %arg6[%c0_4, %c0_5], %2 {strides = array<i32>} : memref<32x32xf32, #tpu.memory_space<vmem>>, vector<32x8xf32>,
    %c0_6 = arith.constant 0 : index
    %c1 = arith.constant 1 : index
    %c0_7 = arith.constant 0 : index
    %c0_8 = arith.constant 0 : index
    %c0_9 = arith.constant 0 : index
    %4 = vector.load %arg2[%c0_6, %c1, %c0_7, %c0_8, %c0_9] : memref<1x4x4x8x32xf32, #tpu.memory_space<vmem>>, vector<1x1x1x8x32xf32>
    %5 = vector.shape_cast %4 : vector<1x1x1x8x32xf32> to vector<8x32xf32>
    %6 = tpu.transpose %5, [1, 0] : vector<8x32xf32> -> vector<32x8xf32>
    %c0_10 = arith.constant 0 : index
    %c8 = arith.constant 8 : index
    %7 = vector.load %arg6[%c0_10, %c8] : memref<32x32xf32, #tpu.memory_space<vmem>>, vector<32x8xf32>
    tpu.vector_store %arg6[%c0_10, %c8], %6 {strides = array<i32>} : memref<32x32xf32, #tpu.memory_space<vmem>>, vector<32x8xf32>,
    %c0_11 = arith.constant 0 : index
    %c2 = arith.constant 2 : index
    %c0_12 = arith.constant 0 : index
    %c0_13 = arith.constant 0 : index
    %c0_14 = arith.constant 0 : index
    %8 = vector.load %arg2[%c0_11, %c2, %c0_12, %c0_13, %c0_14] : memref<1x4x4x8x32xf32, #tpu.memory_space<vmem>>, vector<1x1x1x8x32xf32>
    %9 = vector.shape_cast %8 : vector<1x1x1x8x32xf32> to vector<8x32xf32>
    %10 = tpu.transpose %9, [1, 0] : vector<8x32xf32> -> vector<32x8xf32>
    %c0_15 = arith.constant 0 : index
    %c16 = arith.constant 16 : index
    %11 = vector.load %arg6[%c0_15, %c16] : memref<32x32xf32, #tpu.memory_space<vmem>>, vector<32x8xf32>
    tpu.vector_store %arg6[%c0_15, %c16], %10 {strides = array<i32>} : memref<32x32xf32, #tpu.memory_space<vmem>>, vector<32x8xf32>,
    %c0_16 = arith.constant 0 : index
    %c3 = arith.constant 3 : index
    %c0_17 = arith.constant 0 : index
    %c0_18 = arith.constant 0 : index
    %c0_19 = arith.constant 0 : index
    %12 = vector.load %arg2[%c0_16, %c3, %c0_17, %c0_18, %c0_19] : memref<1x4x4x8x32xf32, #tpu.memory_space<vmem>>, vector<1x1x1x8x32xf32>
    %13 = vector.shape_cast %12 : vector<1x1x1x8x32xf32> to vector<8x32xf32>
    %14 = tpu.transpose %13, [1, 0] : vector<8x32xf32> -> vector<32x8xf32>
    %c0_20 = arith.constant 0 : index
    %c24 = arith.constant 24 : index
    %15 = vector.load %arg6[%c0_20, %c24] : memref<32x32xf32, #tpu.memory_space<vmem>>, vector<32x8xf32>
    tpu.vector_store %arg6[%c0_20, %c24], %14 {strides = array<i32>} : memref<32x32xf32, #tpu.memory_space<vmem>>, vector<32x8xf32>,
    %c0_21 = arith.constant 0 : index
    %c0_22 = arith.constant 0 : index
    %16 = tpu.strided_load %arg6[%c0_21, %c0_22] {strides = array<i32: 8, 1>} : memref<32x32xf32, #tpu.memory_space<vmem>>, vector<4x32xf32>
    %c1_23 = arith.constant 1 : index
    %c0_24 = arith.constant 0 : index
    %17 = tpu.strided_load %arg6[%c1_23, %c0_24] {strides = array<i32: 8, 1>} : memref<32x32xf32, #tpu.memory_space<vmem>>, vector<4x32xf32>
    %c2_25 = arith.constant 2 : index
    %c0_26 = arith.constant 0 : index
    %18 = tpu.strided_load %arg6[%c2_25, %c0_26] {strides = array<i32: 8, 1>} : memref<32x32xf32, #tpu.memory_space<vmem>>, vector<4x32xf32>
    %c3_27 = arith.constant 3 : index
    %c0_28 = arith.constant 0 : index
    %19 = tpu.strided_load %arg6[%c3_27, %c0_28] {strides = array<i32: 8, 1>} : memref<32x32xf32, #tpu.memory_space<vmem>>, vector<4x32xf32>
    %c4 = arith.constant 4 : index
    %c0_29 = arith.constant 0 : index
    %20 = tpu.strided_load %arg6[%c4, %c0_29] {strides = array<i32: 8, 1>} : memref<32x32xf32, #tpu.memory_space<vmem>>, vector<4x32xf32>
    %c5 = arith.constant 5 : index
    %c0_30 = arith.constant 0 : index
    %21 = tpu.strided_load %arg6[%c5, %c0_30] {strides = array<i32: 8, 1>} : memref<32x32xf32, #tpu.memory_space<vmem>>, vector<4x32xf32>
    %c6 = arith.constant 6 : index
    %c0_31 = arith.constant 0 : index
    %22 = tpu.strided_load %arg6[%c6, %c0_31] {strides = array<i32: 8, 1>} : memref<32x32xf32, #tpu.memory_space<vmem>>, vector<4x32xf32>
    %c7 = arith.constant 7 : index
    %c0_32 = arith.constant 0 : index
    %23 = tpu.strided_load %arg6[%c7, %c0_32] {strides = array<i32: 8, 1>} : memref<32x32xf32, #tpu.memory_space<vmem>>, vector<4x32xf32>
    %24 = tpu.concatenate %16, %17, %18, %19, %20, %21, %22, %23 in 1 : vector<4x32xf32>, vector<4x32xf32>, vector<4x32xf32>, vector<4x32xf32>, vector<4x32xf32>, vector<4x32xf32>, vector<4x32xf32>, vector<4x32xf32> -> vector<4x256xf32>
    %25 = arith.truncf %24 : vector<4x256xf32> to vector<4x256xbf16>
    %c0_33 = arith.constant 0 : index
    %c0_34 = arith.constant 0 : index
    %26 = vector.load %arg3[%c0_33, %c0_34] : memref<256x32xbf16, #tpu.memory_space<vmem>>, vector<256x32xbf16>
    %cst = arith.constant dense<0.000000e+00> : vector<4x32xf32>
    %27 = tpu.matmul %25, %26, %cst {dimension_numbers = #tpu.dot_dimension_numbers<[1], [0], [0], [1], [0, 0, 1, 1], [], []>} : vector<4x256xbf16>, vector<256x32xbf16>, vector<4x32xf32> -> vector<4x32xf32>
    %c0_35 = arith.constant 0 : index
    %c0_36 = arith.constant 0 : index
    %28 = vector.load %arg4[%c0_35, %c0_36] : memref<1x32xf32, #tpu.memory_space<vmem>>, vector<1x32xf32>
    %29 = vector.broadcast %28 : vector<1x32xf32> to vector<4x32xf32>
    %30 = arith.addf %27, %29 : vector<4x32xf32>
    %31 = arith.truncf %30 : vector<4x32xf32> to vector<4x32xbf16>
    %c0_37 = arith.constant 0 : index
    %c0_38 = arith.constant 0 : index
    %c0_39 = arith.constant 0 : index
    %32 = vector.load %arg5[%c0_37, %c0_38, %c0_39] : memref<1x16x32xbf16, #tpu.memory_space<vmem>>, vector<1x4x32xbf16>
    %33 = vector.shape_cast %32 : vector<1x4x32xbf16> to vector<4x32xbf16>
    %34 = vector.shape_cast %31 : vector<4x32xbf16> to vector<1x4x32xbf16>
    tpu.vector_store %arg5[%c0_37, %c0_38, %c0_39], %34 {strides = array<i32>} : memref<1x16x32xbf16, #tpu.memory_space<vmem>>, vector<1x4x32xbf16>,
    %c0_40 = arith.constant 0 : index
    %c0_41 = arith.constant 0 : index
    %c1_42 = arith.constant 1 : index
    %c0_43 = arith.constant 0 : index
    %c0_44 = arith.constant 0 : index
    %35 = vector.load %arg2[%c0_40, %c0_41, %c1_42, %c0_43, %c0_44] : memref<1x4x4x8x32xf32, #tpu.memory_space<vmem>>, vector<1x1x1x8x32xf32>
    %36 = vector.shape_cast %35 : vector<1x1x1x8x32xf32> to vector<8x32xf32>
    %37 = tpu.transpose %36, [1, 0] : vector<8x32xf32> -> vector<32x8xf32>
    %c0_45 = arith.constant 0 : index
    %c0_46 = arith.constant 0 : index
    %38 = vector.load %arg6[%c0_45, %c0_46] : memref<32x32xf32, #tpu.memory_space<vmem>>, vector<32x8xf32>
    tpu.vector_store %arg6[%c0_45, %c0_46], %37 {strides = array<i32>} : memref<32x32xf32, #tpu.memory_space<vmem>>, vector<32x8xf32>,
    %c0_47 = arith.constant 0 : index
    %c1_48 = arith.constant 1 : index
    %c1_49 = arith.constant 1 : index
    %c0_50 = arith.constant 0 : index
    %c0_51 = arith.constant 0 : index
    %39 = vector.load %arg2[%c0_47, %c1_48, %c1_49, %c0_50, %c0_51] : memref<1x4x4x8x32xf32, #tpu.memory_space<vmem>>, vector<1x1x1x8x32xf32>
    %40 = vector.shape_cast %39 : vector<1x1x1x8x32xf32> to vector<8x32xf32>
    %41 = tpu.transpose %40, [1, 0] : vector<8x32xf32> -> vector<32x8xf32>
    %c0_52 = arith.constant 0 : index
    %c8_53 = arith.constant 8 : index
    %42 = vector.load %arg6[%c0_52, %c8_53] : memref<32x32xf32, #tpu.memory_space<vmem>>, vector<32x8xf32>
    tpu.vector_store %arg6[%c0_52, %c8_53], %41 {strides = array<i32>} : memref<32x32xf32, #tpu.memory_space<vmem>>, vector<32x8xf32>,
    %c0_54 = arith.constant 0 : index
    %c2_55 = arith.constant 2 : index
    %c1_56 = arith.constant 1 : index
    %c0_57 = arith.constant 0 : index
    %c0_58 = arith.constant 0 : index
    %43 = vector.load %arg2[%c0_54, %c2_55, %c1_56, %c0_57, %c0_58] : memref<1x4x4x8x32xf32, #tpu.memory_space<vmem>>, vector<1x1x1x8x32xf32>
    %44 = vector.shape_cast %43 : vector<1x1x1x8x32xf32> to vector<8x32xf32>
    %45 = tpu.transpose %44, [1, 0] : vector<8x32xf32> -> vector<32x8xf32>
    %c0_59 = arith.constant 0 : index
    %c16_60 = arith.constant 16 : index
    %46 = vector.load %arg6[%c0_59, %c16_60] : memref<32x32xf32, #tpu.memory_space<vmem>>, vector<32x8xf32>
    tpu.vector_store %arg6[%c0_59, %c16_60], %45 {strides = array<i32>} : memref<32x32xf32, #tpu.memory_space<vmem>>, vector<32x8xf32>,
    %c0_61 = arith.constant 0 : index
    %c3_62 = arith.constant 3 : index
    %c1_63 = arith.constant 1 : index
    %c0_64 = arith.constant 0 : index
    %c0_65 = arith.constant 0 : index
    %47 = vector.load %arg2[%c0_61, %c3_62, %c1_63, %c0_64, %c0_65] : memref<1x4x4x8x32xf32, #tpu.memory_space<vmem>>, vector<1x1x1x8x32xf32>
    %48 = vector.shape_cast %47 : vector<1x1x1x8x32xf32> to vector<8x32xf32>
    %49 = tpu.transpose %48, [1, 0] : vector<8x32xf32> -> vector<32x8xf32>
    %c0_66 = arith.constant 0 : index
    %c24_67 = arith.constant 24 : index
    %50 = vector.load %arg6[%c0_66, %c24_67] : memref<32x32xf32, #tpu.memory_space<vmem>>, vector<32x8xf32>
    tpu.vector_store %arg6[%c0_66, %c24_67], %49 {strides = array<i32>} : memref<32x32xf32, #tpu.memory_space<vmem>>, vector<32x8xf32>,
    %c0_68 = arith.constant 0 : index
    %c0_69 = arith.constant 0 : index
    %51 = tpu.strided_load %arg6[%c0_68, %c0_69] {strides = array<i32: 8, 1>} : memref<32x32xf32, #tpu.memory_space<vmem>>, vector<4x32xf32>
    %c1_70 = arith.constant 1 : index
    %c0_71 = arith.constant 0 : index
    %52 = tpu.strided_load %arg6[%c1_70, %c0_71] {strides = array<i32: 8, 1>} : memref<32x32xf32, #tpu.memory_space<vmem>>, vector<4x32xf32>
    %c2_72 = arith.constant 2 : index
    %c0_73 = arith.constant 0 : index
    %53 = tpu.strided_load %arg6[%c2_72, %c0_73] {strides = array<i32: 8, 1>} : memref<32x32xf32, #tpu.memory_space<vmem>>, vector<4x32xf32>
    %c3_74 = arith.constant 3 : index
    %c0_75 = arith.constant 0 : index
    %54 = tpu.strided_load %arg6[%c3_74, %c0_75] {strides = array<i32: 8, 1>} : memref<32x32xf32, #tpu.memory_space<vmem>>, vector<4x32xf32>
    %c4_76 = arith.constant 4 : index
    %c0_77 = arith.constant 0 : index
    %55 = tpu.strided_load %arg6[%c4_76, %c0_77] {strides = array<i32: 8, 1>} : memref<32x32xf32, #tpu.memory_space<vmem>>, vector<4x32xf32>
    %c5_78 = arith.constant 5 : index
    %c0_79 = arith.constant 0 : index
    %56 = tpu.strided_load %arg6[%c5_78, %c0_79] {strides = array<i32: 8, 1>} : memref<32x32xf32, #tpu.memory_space<vmem>>, vector<4x32xf32>
    %c6_80 = arith.constant 6 : index
    %c0_81 = arith.constant 0 : index
    %57 = tpu.strided_load %arg6[%c6_80, %c0_81] {strides = array<i32: 8, 1>} : memref<32x32xf32, #tpu.memory_space<vmem>>, vector<4x32xf32>
    %c7_82 = arith.constant 7 : index
    %c0_83 = arith.constant 0 : index
    %58 = tpu.strided_load %arg6[%c7_82, %c0_83] {strides = array<i32: 8, 1>} : memref<32x32xf32, #tpu.memory_space<vmem>>, vector<4x32xf32>
    %59 = tpu.concatenate %51, %52, %53, %54, %55, %56, %57, %58 in 1 : vector<4x32xf32>, vector<4x32xf32>, vector<4x32xf32>, vector<4x32xf32>, vector<4x32xf32>, vector<4x32xf32>, vector<4x32xf32>, vector<4x32xf32> -> vector<4x256xf32>
    %60 = arith.truncf %59 : vector<4x256xf32> to vector<4x256xbf16>
    %c0_84 = arith.constant 0 : index
    %c0_85 = arith.constant 0 : index
    %61 = vector.load %arg3[%c0_84, %c0_85] : memref<256x32xbf16, #tpu.memory_space<vmem>>, vector<256x32xbf16>
    %cst_86 = arith.constant dense<0.000000e+00> : vector<4x32xf32>
    %62 = tpu.matmul %60, %61, %cst_86 {dimension_numbers = #tpu.dot_dimension_numbers<[1], [0], [0], [1], [0, 0, 1, 1], [], []>} : vector<4x256xbf16>, vector<256x32xbf16>, vector<4x32xf32> -> vector<4x32xf32>
    %c0_87 = arith.constant 0 : index
    %c0_88 = arith.constant 0 : index
    %63 = vector.load %arg4[%c0_87, %c0_88] : memref<1x32xf32, #tpu.memory_space<vmem>>, vector<1x32xf32>
    %64 = vector.broadcast %63 : vector<1x32xf32> to vector<4x32xf32>
    %65 = arith.addf %62, %64 : vector<4x32xf32>
    %66 = arith.truncf %65 : vector<4x32xf32> to vector<4x32xbf16>
    %c0_89 = arith.constant 0 : index
    %c4_90 = arith.constant 4 : index
    %c0_91 = arith.constant 0 : index
    %67 = vector.load %arg5[%c0_89, %c4_90, %c0_91] : memref<1x16x32xbf16, #tpu.memory_space<vmem>>, vector<1x4x32xbf16>
    %68 = vector.shape_cast %67 : vector<1x4x32xbf16> to vector<4x32xbf16>
    %69 = vector.shape_cast %66 : vector<4x32xbf16> to vector<1x4x32xbf16>
    tpu.vector_store %arg5[%c0_89, %c4_90, %c0_91], %69 {strides = array<i32>} : memref<1x16x32xbf16, #tpu.memory_space<vmem>>, vector<1x4x32xbf16>,
    %c0_92 = arith.constant 0 : index
    %c0_93 = arith.constant 0 : index
    %c2_94 = arith.constant 2 : index
    %c0_95 = arith.constant 0 : index
    %c0_96 = arith.constant 0 : index
    %70 = vector.load %arg2[%c0_92, %c0_93, %c2_94, %c0_95, %c0_96] : memref<1x4x4x8x32xf32, #tpu.memory_space<vmem>>, vector<1x1x1x8x32xf32>
    %71 = vector.shape_cast %70 : vector<1x1x1x8x32xf32> to vector<8x32xf32>
    %72 = tpu.transpose %71, [1, 0] : vector<8x32xf32> -> vector<32x8xf32>
    %c0_97 = arith.constant 0 : index
    %c0_98 = arith.constant 0 : index
    %73 = vector.load %arg6[%c0_97, %c0_98] : memref<32x32xf32, #tpu.memory_space<vmem>>, vector<32x8xf32>
    tpu.vector_store %arg6[%c0_97, %c0_98], %72 {strides = array<i32>} : memref<32x32xf32, #tpu.memory_space<vmem>>, vector<32x8xf32>,
    %c0_99 = arith.constant 0 : index
    %c1_100 = arith.constant 1 : index
    %c2_101 = arith.constant 2 : index
    %c0_102 = arith.constant 0 : index
    %c0_103 = arith.constant 0 : index
    %74 = vector.load %arg2[%c0_99, %c1_100, %c2_101, %c0_102, %c0_103] : memref<1x4x4x8x32xf32, #tpu.memory_space<vmem>>, vector<1x1x1x8x32xf32>
    %75 = vector.shape_cast %74 : vector<1x1x1x8x32xf32> to vector<8x32xf32>
    %76 = tpu.transpose %75, [1, 0] : vector<8x32xf32> -> vector<32x8xf32>
    %c0_104 = arith.constant 0 : index
    %c8_105 = arith.constant 8 : index
    %77 = vector.load %arg6[%c0_104, %c8_105] : memref<32x32xf32, #tpu.memory_space<vmem>>, vector<32x8xf32>
    tpu.vector_store %arg6[%c0_104, %c8_105], %76 {strides = array<i32>} : memref<32x32xf32, #tpu.memory_space<vmem>>, vector<32x8xf32>,
    %c0_106 = arith.constant 0 : index
    %c2_107 = arith.constant 2 : index
    %c2_108 = arith.constant 2 : index
    %c0_109 = arith.constant 0 : index
    %c0_110 = arith.constant 0 : index
    %78 = vector.load %arg2[%c0_106, %c2_107, %c2_108, %c0_109, %c0_110] : memref<1x4x4x8x32xf32, #tpu.memory_space<vmem>>, vector<1x1x1x8x32xf32>
    %79 = vector.shape_cast %78 : vector<1x1x1x8x32xf32> to vector<8x32xf32>
    %80 = tpu.transpose %79, [1, 0] : vector<8x32xf32> -> vector<32x8xf32>
    %c0_111 = arith.constant 0 : index
    %c16_112 = arith.constant 16 : index
    %81 = vector.load %arg6[%c0_111, %c16_112] : memref<32x32xf32, #tpu.memory_space<vmem>>, vector<32x8xf32>
    tpu.vector_store %arg6[%c0_111, %c16_112], %80 {strides = array<i32>} : memref<32x32xf32, #tpu.memory_space<vmem>>, vector<32x8xf32>,
    %c0_113 = arith.constant 0 : index
    %c3_114 = arith.constant 3 : index
    %c2_115 = arith.constant 2 : index
    %c0_116 = arith.constant 0 : index
    %c0_117 = arith.constant 0 : index
    %82 = vector.load %arg2[%c0_113, %c3_114, %c2_115, %c0_116, %c0_117] : memref<1x4x4x8x32xf32, #tpu.memory_space<vmem>>, vector<1x1x1x8x32xf32>
    %83 = vector.shape_cast %82 : vector<1x1x1x8x32xf32> to vector<8x32xf32>
    %84 = tpu.transpose %83, [1, 0] : vector<8x32xf32> -> vector<32x8xf32>
    %c0_118 = arith.constant 0 : index
    %c24_119 = arith.constant 24 : index
    %85 = vector.load %arg6[%c0_118, %c24_119] : memref<32x32xf32, #tpu.memory_space<vmem>>, vector<32x8xf32>
    tpu.vector_store %arg6[%c0_118, %c24_119], %84 {strides = array<i32>} : memref<32x32xf32, #tpu.memory_space<vmem>>, vector<32x8xf32>,
    %c0_120 = arith.constant 0 : index
    %c0_121 = arith.constant 0 : index
    %86 = tpu.strided_load %arg6[%c0_120, %c0_121] {strides = array<i32: 8, 1>} : memref<32x32xf32, #tpu.memory_space<vmem>>, vector<4x32xf32>
    %c1_122 = arith.constant 1 : index
    %c0_123 = arith.constant 0 : index
    %87 = tpu.strided_load %arg6[%c1_122, %c0_123] {strides = array<i32: 8, 1>} : memref<32x32xf32, #tpu.memory_space<vmem>>, vector<4x32xf32>
    %c2_124 = arith.constant 2 : index
    %c0_125 = arith.constant 0 : index
    %88 = tpu.strided_load %arg6[%c2_124, %c0_125] {strides = array<i32: 8, 1>} : memref<32x32xf32, #tpu.memory_space<vmem>>, vector<4x32xf32>
    %c3_126 = arith.constant 3 : index
    %c0_127 = arith.constant 0 : index
    %89 = tpu.strided_load %arg6[%c3_126, %c0_127] {strides = array<i32: 8, 1>} : memref<32x32xf32, #tpu.memory_space<vmem>>, vector<4x32xf32>
    %c4_128 = arith.constant 4 : index
    %c0_129 = arith.constant 0 : index
    %90 = tpu.strided_load %arg6[%c4_128, %c0_129] {strides = array<i32: 8, 1>} : memref<32x32xf32, #tpu.memory_space<vmem>>, vector<4x32xf32>
    %c5_130 = arith.constant 5 : index
    %c0_131 = arith.constant 0 : index
    %91 = tpu.strided_load %arg6[%c5_130, %c0_131] {strides = array<i32: 8, 1>} : memref<32x32xf32, #tpu.memory_space<vmem>>, vector<4x32xf32>
    %c6_132 = arith.constant 6 : index
    %c0_133 = arith.constant 0 : index
    %92 = tpu.strided_load %arg6[%c6_132, %c0_133] {strides = array<i32: 8, 1>} : memref<32x32xf32, #tpu.memory_space<vmem>>, vector<4x32xf32>
    %c7_134 = arith.constant 7 : index
    %c0_135 = arith.constant 0 : index
    %93 = tpu.strided_load %arg6[%c7_134, %c0_135] {strides = array<i32: 8, 1>} : memref<32x32xf32, #tpu.memory_space<vmem>>, vector<4x32xf32>
    %94 = tpu.concatenate %86, %87, %88, %89, %90, %91, %92, %93 in 1 : vector<4x32xf32>, vector<4x32xf32>, vector<4x32xf32>, vector<4x32xf32>, vector<4x32xf32>, vector<4x32xf32>, vector<4x32xf32>, vector<4x32xf32> -> vector<4x256xf32>
    %95 = arith.truncf %94 : vector<4x256xf32> to vector<4x256xbf16>
    %c0_136 = arith.constant 0 : index
    %c0_137 = arith.constant 0 : index
    %96 = vector.load %arg3[%c0_136, %c0_137] : memref<256x32xbf16, #tpu.memory_space<vmem>>, vector<256x32xbf16>
    %cst_138 = arith.constant dense<0.000000e+00> : vector<4x32xf32>
    %97 = tpu.matmul %95, %96, %cst_138 {dimension_numbers = #tpu.dot_dimension_numbers<[1], [0], [0], [1], [0, 0, 1, 1], [], []>} : vector<4x256xbf16>, vector<256x32xbf16>, vector<4x32xf32> -> vector<4x32xf32>
    %c0_139 = arith.constant 0 : index
    %c0_140 = arith.constant 0 : index
    %98 = vector.load %arg4[%c0_139, %c0_140] : memref<1x32xf32, #tpu.memory_space<vmem>>, vector<1x32xf32>
    %99 = vector.broadcast %98 : vector<1x32xf32> to vector<4x32xf32>
    %100 = arith.addf %97, %99 : vector<4x32xf32>
    %101 = arith.truncf %100 : vector<4x32xf32> to vector<4x32xbf16>
    %c0_141 = arith.constant 0 : index
    %c8_142 = arith.constant 8 : index
    %c0_143 = arith.constant 0 : index
    %102 = vector.load %arg5[%c0_141, %c8_142, %c0_143] : memref<1x16x32xbf16, #tpu.memory_space<vmem>>, vector<1x4x32xbf16>
    %103 = vector.shape_cast %102 : vector<1x4x32xbf16> to vector<4x32xbf16>
    %104 = vector.shape_cast %101 : vector<4x32xbf16> to vector<1x4x32xbf16>
    tpu.vector_store %arg5[%c0_141, %c8_142, %c0_143], %104 {strides = array<i32>} : memref<1x16x32xbf16, #tpu.memory_space<vmem>>, vector<1x4x32xbf16>,
    %c0_144 = arith.constant 0 : index
    %c0_145 = arith.constant 0 : index
    %c3_146 = arith.constant 3 : index
    %c0_147 = arith.constant 0 : index
    %c0_148 = arith.constant 0 : index
    %105 = vector.load %arg2[%c0_144, %c0_145, %c3_146, %c0_147, %c0_148] : memref<1x4x4x8x32xf32, #tpu.memory_space<vmem>>, vector<1x1x1x8x32xf32>
    %106 = vector.shape_cast %105 : vector<1x1x1x8x32xf32> to vector<8x32xf32>
    %107 = tpu.transpose %106, [1, 0] : vector<8x32xf32> -> vector<32x8xf32>
    %c0_149 = arith.constant 0 : index
    %c0_150 = arith.constant 0 : index
    %108 = vector.load %arg6[%c0_149, %c0_150] : memref<32x32xf32, #tpu.memory_space<vmem>>, vector<32x8xf32>
    tpu.vector_store %arg6[%c0_149, %c0_150], %107 {strides = array<i32>} : memref<32x32xf32, #tpu.memory_space<vmem>>, vector<32x8xf32>,
    %c0_151 = arith.constant 0 : index
    %c1_152 = arith.constant 1 : index
    %c3_153 = arith.constant 3 : index
    %c0_154 = arith.constant 0 : index
    %c0_155 = arith.constant 0 : index
    %109 = vector.load %arg2[%c0_151, %c1_152, %c3_153, %c0_154, %c0_155] : memref<1x4x4x8x32xf32, #tpu.memory_space<vmem>>, vector<1x1x1x8x32xf32>
    %110 = vector.shape_cast %109 : vector<1x1x1x8x32xf32> to vector<8x32xf32>
    %111 = tpu.transpose %110, [1, 0] : vector<8x32xf32> -> vector<32x8xf32>
    %c0_156 = arith.constant 0 : index
    %c8_157 = arith.constant 8 : index
    %112 = vector.load %arg6[%c0_156, %c8_157] : memref<32x32xf32, #tpu.memory_space<vmem>>, vector<32x8xf32>
    tpu.vector_store %arg6[%c0_156, %c8_157], %111 {strides = array<i32>} : memref<32x32xf32, #tpu.memory_space<vmem>>, vector<32x8xf32>,
    %c0_158 = arith.constant 0 : index
    %c2_159 = arith.constant 2 : index
    %c3_160 = arith.constant 3 : index
    %c0_161 = arith.constant 0 : index
    %c0_162 = arith.constant 0 : index
    %113 = vector.load %arg2[%c0_158, %c2_159, %c3_160, %c0_161, %c0_162] : memref<1x4x4x8x32xf32, #tpu.memory_space<vmem>>, vector<1x1x1x8x32xf32>
    %114 = vector.shape_cast %113 : vector<1x1x1x8x32xf32> to vector<8x32xf32>
    %115 = tpu.transpose %114, [1, 0] : vector<8x32xf32> -> vector<32x8xf32>
    %c0_163 = arith.constant 0 : index
    %c16_164 = arith.constant 16 : index
    %116 = vector.load %arg6[%c0_163, %c16_164] : memref<32x32xf32, #tpu.memory_space<vmem>>, vector<32x8xf32>
    tpu.vector_store %arg6[%c0_163, %c16_164], %115 {strides = array<i32>} : memref<32x32xf32, #tpu.memory_space<vmem>>, vector<32x8xf32>,
    %c0_165 = arith.constant 0 : index
    %c3_166 = arith.constant 3 : index
    %c3_167 = arith.constant 3 : index
    %c0_168 = arith.constant 0 : index
    %c0_169 = arith.constant 0 : index
    %117 = vector.load %arg2[%c0_165, %c3_166, %c3_167, %c0_168, %c0_169] : memref<1x4x4x8x32xf32, #tpu.memory_space<vmem>>, vector<1x1x1x8x32xf32>
    %118 = vector.shape_cast %117 : vector<1x1x1x8x32xf32> to vector<8x32xf32>
    %119 = tpu.transpose %118, [1, 0] : vector<8x32xf32> -> vector<32x8xf32>
    %c0_170 = arith.constant 0 : index
    %c24_171 = arith.constant 24 : index
    %120 = vector.load %arg6[%c0_170, %c24_171] : memref<32x32xf32, #tpu.memory_space<vmem>>, vector<32x8xf32>
    tpu.vector_store %arg6[%c0_170, %c24_171], %119 {strides = array<i32>} : memref<32x32xf32, #tpu.memory_space<vmem>>, vector<32x8xf32>,
    %c0_172 = arith.constant 0 : index
    %c0_173 = arith.constant 0 : index
    %121 = tpu.strided_load %arg6[%c0_172, %c0_173] {strides = array<i32: 8, 1>} : memref<32x32xf32, #tpu.memory_space<vmem>>, vector<4x32xf32>
    %c1_174 = arith.constant 1 : index
    %c0_175 = arith.constant 0 : index
    %122 = tpu.strided_load %arg6[%c1_174, %c0_175] {strides = array<i32: 8, 1>} : memref<32x32xf32, #tpu.memory_space<vmem>>, vector<4x32xf32>
    %c2_176 = arith.constant 2 : index
    %c0_177 = arith.constant 0 : index
    %123 = tpu.strided_load %arg6[%c2_176, %c0_177] {strides = array<i32: 8, 1>} : memref<32x32xf32, #tpu.memory_space<vmem>>, vector<4x32xf32>
    %c3_178 = arith.constant 3 : index
    %c0_179 = arith.constant 0 : index
    %124 = tpu.strided_load %arg6[%c3_178, %c0_179] {strides = array<i32: 8, 1>} : memref<32x32xf32, #tpu.memory_space<vmem>>, vector<4x32xf32>
    %c4_180 = arith.constant 4 : index
    %c0_181 = arith.constant 0 : index
    %125 = tpu.strided_load %arg6[%c4_180, %c0_181] {strides = array<i32: 8, 1>} : memref<32x32xf32, #tpu.memory_space<vmem>>, vector<4x32xf32>
    %c5_182 = arith.constant 5 : index
    %c0_183 = arith.constant 0 : index
    %126 = tpu.strided_load %arg6[%c5_182, %c0_183] {strides = array<i32: 8, 1>} : memref<32x32xf32, #tpu.memory_space<vmem>>, vector<4x32xf32>
    %c6_184 = arith.constant 6 : index
    %c0_185 = arith.constant 0 : index
    %127 = tpu.strided_load %arg6[%c6_184, %c0_185] {strides = array<i32: 8, 1>} : memref<32x32xf32, #tpu.memory_space<vmem>>, vector<4x32xf32>
    %c7_186 = arith.constant 7 : index
    %c0_187 = arith.constant 0 : index
    %128 = tpu.strided_load %arg6[%c7_186, %c0_187] {strides = array<i32: 8, 1>} : memref<32x32xf32, #tpu.memory_space<vmem>>, vector<4x32xf32>
    %129 = tpu.concatenate %121, %122, %123, %124, %125, %126, %127, %128 in 1 : vector<4x32xf32>, vector<4x32xf32>, vector<4x32xf32>, vector<4x32xf32>, vector<4x32xf32>, vector<4x32xf32>, vector<4x32xf32>, vector<4x32xf32> -> vector<4x256xf32>
    %130 = arith.truncf %129 : vector<4x256xf32> to vector<4x256xbf16>
    %c0_188 = arith.constant 0 : index
    %c0_189 = arith.constant 0 : index
    %131 = vector.load %arg3[%c0_188, %c0_189] : memref<256x32xbf16, #tpu.memory_space<vmem>>, vector<256x32xbf16>
    %cst_190 = arith.constant dense<0.000000e+00> : vector<4x32xf32>
    %132 = tpu.matmul %130, %131, %cst_190 {dimension_numbers = #tpu.dot_dimension_numbers<[1], [0], [0], [1], [0, 0, 1, 1], [], []>} : vector<4x256xbf16>, vector<256x32xbf16>, vector<4x32xf32> -> vector<4x32xf32>
    %c0_191 = arith.constant 0 : index
    %c0_192 = arith.constant 0 : index
    %133 = vector.load %arg4[%c0_191, %c0_192] : memref<1x32xf32, #tpu.memory_space<vmem>>, vector<1x32xf32>
    %134 = vector.broadcast %133 : vector<1x32xf32> to vector<4x32xf32>
    %135 = arith.addf %132, %134 : vector<4x32xf32>
    %136 = arith.truncf %135 : vector<4x32xf32> to vector<4x32xbf16>
    %c0_193 = arith.constant 0 : index
    %c12 = arith.constant 12 : index
    %c0_194 = arith.constant 0 : index
    %137 = vector.load %arg5[%c0_193, %c12, %c0_194] : memref<1x16x32xbf16, #tpu.memory_space<vmem>>, vector<1x4x32xbf16>
    %138 = vector.shape_cast %137 : vector<1x4x32xbf16> to vector<4x32xbf16>
    %139 = vector.shape_cast %136 : vector<4x32xbf16> to vector<1x4x32xbf16>
    tpu.vector_store %arg5[%c0_193, %c12, %c0_194], %139 {strides = array<i32>} : memref<1x16x32xbf16, #tpu.memory_space<vmem>>, vector<1x4x32xbf16>,
    return
  }
  func.func @transform_0(%arg0: i32, %arg1: i32) -> (i32, i32, i32, i32, i32) {
    %c0_i32 = arith.constant 0 : i32
    %c0_i32_0 = arith.constant 0 : i32
    %c0_i32_1 = arith.constant 0 : i32
    %c0_i32_2 = arith.constant 0 : i32
    return %arg0, %c0_i32, %arg1, %c0_i32_0, %c0_i32_1 : i32, i32, i32, i32, i32
  }
  func.func @transform_1(%arg0: i32, %arg1: i32) -> (i32, i32) {
    %c0_i32 = arith.constant 0 : i32
    %c0_i32_0 = arith.constant 0 : i32
    %c0_i32_1 = arith.constant 0 : i32
    return %c0_i32, %c0_i32_0 : i32, i32
  }
  func.func @transform_2(%arg0: i32, %arg1: i32) -> (i32, i32) {
    %c0_i32 = arith.constant 0 : i32
    %c0_i32_0 = arith.constant 0 : i32
    %c0_i32_1 = arith.constant 0 : i32
    return %c0_i32, %c0_i32_0 : i32, i32
  }
  func.func @transform_3(%arg0: i32, %arg1: i32) -> (i32, i32, i32) {
    %c0_i32 = arith.constant 0 : i32
    %c0_i32_0 = arith.constant 0 : i32
    return %arg0, %arg1, %c0_i32 : i32, i32, i32
  }
}

</mosaic_0001>

<bundles_post_ra>
// kernel: patch_embed_forward.1
= control target key start
LH: loop header
LB: loop body
LE: loop exit
PB: predicated region body
PF: predicated region fallthrough
CT: control target
= control target key end

     0   :  { %8 = vsyncpa [#allocation4], 0  ;;  %s3032_s0 = inlined_call_operand.vmem [shape: f32[2,4,4,8,32], index: 0, kind: input, shape index: {}]   ;;  %s3033_s1 = inlined_call_operand.vmem [shape: bf16[256,32], index: 1, kind: input, shape index: {}]   ;;  %s3034_s2 = inlined_call_operand.vmem [shape: f32[1,32], index: 2, kind: input, shape index: {}]   ;;  %s3035_s3 = inlined_call_operand.hbm [shape: bf16[2,16,32], index: 3, kind: output, shape index: {}]  }
   0x1   :  { %10 = vsyncpa [#allocation4 + $0x1], 0  ;;  %s2502_s12 = smov 0   ;;  %s2504_s13 = smov 0  }
   0x2   :  { %s2506_s14 = smov 0   ;;  %s2508_s15 = smov 0  }
   0x3   :  { %s2510_s16 = smov 0   ;;  %s2512_s17 = smov 0  }
   0x4 LB: > { %s1918_s18 = sadd.s32 4294967295, %s2473_s17   ;;  %s1919_s19 = sadd.s32 4294967294, %s2473_s17   ;;  %s2473_s17 = sphi %s2512_s17, %s16_s17   ;;  %s2469_s16 = sphi %s2510_s16, %s3042_s16   ;;  %s2465_s15 = sphi %s2508_s15, %s3041_s15   ;;  %s2461_s14 = sphi %s2506_s14, %s3040_s14   ;;  %s2457_s13 = sphi %s2504_s13, %s3039_s13   ;;  %s2453_s12 = sphi %s2502_s12, %s3038_s12  }
   0x5   : > { %s28_s20 = sadd.s32 1, %s2469_s16  ;;  %s107_s21 = sadd.s32 1, %s2461_s14 }
   0x6   : > { %p30_p0 = scmp.ge.s32.totalorder %s28_s20, 2  ;;  %p117_p1 = scmp.ne.s32.totalorder %s2461_s14, %s2457_s13 }
   0x7   : > { %p118_p2 = scmp.eq.s32.totalorder %s1918_s18, 1  ;;  %p123_p3 = scmp.ne.s32.totalorder %s2457_s13, %s2453_s12 }
   0x8   : > { %s3044_s20 = smov (%p30_p0, %s28_s20), 0  ;;  %p124_p5 = scmp.eq.s32.totalorder %s1919_s19, 1 }
   0x9   : > { %p2542_p4 = por %p118_p2, %p117_p1  ;;  %s102_s23 = ssub.s32 %s2469_s16, %s3044_s20 }
   0xa   : > { %p1922_p6 = scmp.ge.s32.totalorder %s2473_s17, 1  ;;  %p105_p7 = scmp.eq.s32.totalorder %s102_s23, 0 }
   0xb   : > { %p2549_p8 = por %p124_p5, %p123_p3  ;;  %p161_p9 = scmp.lt.s32.totalorder %s2473_s17, 3 }
   0xc   : > { %s2555_s25 = scalar_select %p105_p7, %s2461_s14, %s107_s21  }
   0xd   : > { %p162_p10 = pnand %p1922_p6, %p161_p9 }
   0xe   : > { %p190_p11 = scmp.lt.s32.totalorder (!%p162_p10), %s2465_s15, 1  ;;  %s2475_s4 = smov (!%p162_p10), 16  }
   0xf   : > { %165 = sbr.rel (%p162_p10) target bundleno = 1331 (0x533), region = 32  ;;  %s2476_s5 = smov (!%p162_p10), 24  }
  0x10   : > { %s2477_s6 = smov (!%p162_p10), 8   ;;  %s2478_s7 = smov (!%p162_p10), 32  }
  0x11   : > { %s2479_s8 = smov (!%p162_p10), 96   ;;  %s2480_s9 = smov (!%p162_p10), 64  }
  0x12   : > { %s186_s21 = sand.u32 (!%p162_p10), 1, %s2457_s13   ;;  %s2415_s11 = scalar_lea.hbm (!%p162_p10), %s3035_s3, 16 }
  0x13   : > { %s1923_s23 = sshll.u32 (!%p162_p10), %s186_s21, 3 }
  0x14   : > { %s191_s26 = scalar_select %p190_p11, %s2465_s15, 1  ;;  %vm233_vm0 = vcmask 64512   ;;  %vm288_vm1 = vcmask 130112   ;;  %vm343_vm2 = vcmask 195712   ;;  %vm398_vm3 = vcmask 261312  }
  0x15   : > { %vm442_vm4 = vcmask 261120   ;;  %vm444_vm5 = vcmask 523264   ;;  %vm446_vm6 = vcmask 785408   ;;  %vm612_vm7 = vcmask 254976  }
  0x16   : > { %s2202_s27 = sshll.u32 %s191_s26, 7  ;;  %s2721_s26 = scalar_lea.vmem [#allocation3], %s1923_s23  ;;  %vm1016_vm8 = vcmask 257026  }
  0x17   : > { %s2562_s30 = scalar_lea.vmem %s3032_s0, %s2202_s27  ;;  %s1836_s28 = sshll.u32 %s2721_s26, 4  ;;  %s1837_s28 = int_to_ptr.vmem [resolvable:$true] %s1836_s28 }
  0x18   : > { %v1927_v0 = vld [vmem:[%s2562_s30 + $0x40] sm:$0xff]  ;;  %v1994_v4 = vld [vmem:[%s2562_s30 + $0x28] sm:$0xff]  ;;  %v2062_v27 = vld [vmem:[%s2562_s30 + $0x30] sm:$0xff] }
  0x19   : > { %v200_v1 = vld [vmem:[%s2562_s30] sm:$0xff]  ;;  %295 = vxpose.xlu1.b32.start.end [1/1] (short) (narrow) %v1927_v0, 32  ;;  %v1993_v21 = vld [vmem:[%s2562_s30 + $0x8] sm:$0xff]  ;;  %v2210_v0 = vld [vmem:[%s3033_s1 + $0x38] sm:$0xff] }
  0x1a   : > { %v1928_v2 = vld [vmem:[%s2562_s30 + $0x60] sm:$0xff]  ;;  %201 = vxpose.xlu0.b32.start.end [1/1] (short) (narrow) %v200_v1, 32  ;;  %v1995_v22 = vld [vmem:[%s2562_s30 + $0x48] sm:$0xff]  ;;  %v2218_v1 = vld [vmem:[%s3033_s1 + $0x78] sm:$0xff]  ;;  %585 = vmatpush.bf16.msra.mxu0 %v2210_v0 }
  0x1b   : > { %350 = vxpose.xlu2.b32.start.end [1/1] (short) (narrow) %v1928_v2, 32  ;;  %v1926_v3 = vld [vmem:[%s2562_s30 + $0x20] sm:$0xff]  ;;  %v1996_v25 = vld [vmem:[%s2562_s30 + $0x68] sm:$0xff]  ;;  %598 = vmatpush.bf16.msra.mxu1 %v2218_v1  ;;  %v2209_v2 = vld [vmem:[%s3033_s1 + $0x30] sm:$0xff] }
  0x1e   : > { %586 = vmatpush.bf16.msra.mxu0 %v2209_v2 }
  0x39   : > { %654 = vxpose.xlu1.b32.start.end [1/1] (short) (narrow) %v1994_v4, 32  ;;  %v2208_v4 = vld [vmem:[%s3033_s1 + $0x28] sm:$0xff] }
  0x3a   : > { %240 = vxpose.xlu0.b32.start.end [1/1] (short) (narrow) %v1926_v3, 32  ;;  %v2217_v3 = vld [vmem:[%s3033_s1 + $0x70] sm:$0xff]  ;;  %587 = vmatpush.bf16.msra.mxu0 %v2208_v4 }
  0x3b   : > { %599 = vmatpush.bf16.msra.mxu1 %v2217_v3 }
  0xb4   : > { %v366_v7 = vpop.trf.xlu2 }
  0xbc   : > { %v367_v12 = vpop.trf.xlu2 }
  0xbd   : > { %v311_v5 = vpop.trf.xlu1 }
  0xbe   : > { %v217_v6 = vpop.trf.xlu0 }
  0xbf   : > { %234 = vst.msk [vmem:[#allocation2] sm:$0xff] %vm233_vm0, %v217_v6  ;;  %v2207_v6 = vld [vmem:[%s3033_s1 + $0x20] sm:$0xff] }
  0xc0   : > { %588 = vmatpush.bf16.msra.mxu0 %v2207_v6 }
  0xc4   : > { %v368_v15 = vpop.trf.xlu2 }
  0xc5   : > { %v312_v8 = vpop.trf.xlu1 }
  0xc6   : > { %v218_v9 = vpop.trf.xlu0 }
  0xc7   : > { %235 = vst.msk [vmem:[#allocation2 + $0x8] sm:$0xff] %vm233_vm0, %v218_v9  ;;  %v2206_v9 = vld [vmem:[%s3033_s1 + $0x18] sm:$0xff] }
  0xc8   : > { %589 = vmatpush.bf16.msra.mxu0 %v2206_v9 }
  0xcc   : > { %v369_v17 = vpop.trf.xlu2 }
  0xcd   : > { %v313_v10 = vpop.trf.xlu1 }
  0xce   : > { %v219_v11 = vpop.trf.xlu0 }
  0xcf   : > { %236 = vst.msk [vmem:[#allocation2 + $0x10] sm:$0xff] %vm233_vm0, %v219_v11 }
  0xd5   : > { %v314_v13 = vpop.trf.xlu1 }
  0xd6   : > { %v220_v14 = vpop.trf.xlu0  ;;  %337 = vrot.lane.b32.xlu0 %v314_v13, %s2475_s4  ;;  %v2205_v13 = vld [vmem:[%s3033_s1 + $0x10] sm:$0xff] }
  0xd7   : > { %237 = vst.msk [vmem:[#allocation2 + $0x18] sm:$0xff] %vm233_vm0, %v220_v14  ;;  %v2213_v14 = vld [vmem:[%s3033_s1 + $0x50] sm:$0xff]  ;;  %590 = vmatpush.bf16.msra.mxu0 %v2205_v13 }
  0xdd   : > { %v670_v23 = vpop.trf.xlu1 }
  0xde   : > { %v256_v16 = vpop.trf.xlu0  ;;  %390 = vrot.lane.b32.xlu0 %v368_v15, %s2476_s5 }
  0xdf   : > { %276 = vrot.lane.b32.xlu1 %v256_v16, %s2477_s6  ;;  %v2204_v16 = vld [vmem:[%s3033_s1 + $0x8] sm:$0xff] }
  0xe0   : > { %591 = vmatpush.bf16.msra.mxu0 %v2204_v16 }
  0xe5   : > { %v671_v24 = vpop.trf.xlu1 }
  0xe6   : > { %v257_v18 = vpop.trf.xlu0  ;;  %392 = vrot.lane.b32.xlu0 %v369_v17, %s2476_s5  ;;  %v2212_v17 = vld [vmem:[%s3033_s1 + $0x48] sm:$0xff] }
  0xe7   : > { %278 = vrot.lane.b32.xlu1 %v257_v18, %s2477_s6  ;;  %v2061_v18 = vld [vmem:[%s2562_s30 + $0x10] sm:$0xff] }
  0xed   : > { %v672_v26 = vpop.trf.xlu1 }
  0xee   : > { %v258_v19 = vpop.trf.xlu0 }
  0xef   : > { %386 = vrot.lane.b32.xlu1 %v366_v7, %s2476_s5  ;;  %280 = vrot.lane.b32.xlu2 %v258_v19, %s2477_s6  ;;  %v2215_v7 = vld [vmem:[%s3033_s1 + $0x60] sm:$0xff] }
  0xf5   : > { %v673_v28 = vpop.trf.xlu1 }
  0xf6   : > { %v259_v20 = vpop.trf.xlu0 }
  0xf7   : > { %282 = vrot.lane.b32.xlu2 %v259_v20, %s2477_s6  ;;  %v2203_v20 = vld [vmem:[%s3033_s1] sm:$0xff] }
  0xf8   : > { %592 = vmatpush.bf16.msra.mxu0 %v2203_v20 }
  0xff   : > { %331 = vrot.lane.b32.xlu2 %v311_v5, %s2475_s4  ;;  %v2216_v5 = vld [vmem:[%s3033_s1 + $0x68] sm:$0xff] }
 0x100   : > { %600 = vmatpush.bf16.msra.mxu1 %v2216_v5 }
 0x104   : > { %601 = vmatpush.bf16.msra.mxu1 %v2215_v7 }
 0x107   : > { %333 = vrot.lane.b32.xlu2 %v312_v8, %s2475_s4 }
 0x108   : > { %616 = vxpose.xlu0.b32.start.end [1/1] (short) (narrow) %v1993_v21, 32  ;;  %v2211_v21 = vld [vmem:[%s3033_s1 + $0x40] sm:$0xff] }
 0x10f   : > { %335 = vrot.lane.b32.xlu2 %v313_v10, %s2475_s4  ;;  %v2214_v10 = vld [vmem:[%s3033_s1 + $0x58] sm:$0xff] }
 0x110   : > { %602 = vmatpush.bf16.msra.mxu1 %v2214_v10 }
 0x114   : > { %603 = vmatpush.bf16.msra.mxu1 %v2213_v14 }
 0x117   : > { %388 = vrot.lane.b32.xlu2 %v367_v12, %s2476_s5  ;;  %v2130_v12 = vld [vmem:[%s2562_s30 + $0x38] sm:$0xff] }
 0x118   : > { %604 = vmatpush.bf16.msra.mxu1 %v2212_v17 }
 0x11c   : > { %605 = vmatpush.bf16.msra.mxu1 %v2211_v21 }
 0x128   : > { %708 = vxpose.xlu0.b32.start.end [1/1] (short) (narrow) %v1995_v22, 32 }
 0x13d   : > { %762 = vxpose.xlu2.b32.start.end [1/1] (short) (narrow) %v1996_v25, 32 }
 0x148   : > { %1058 = vxpose.xlu0.b32.start.end [1/1] (short) (narrow) %v2062_v27, 32  ;;  %v338_v30 = vpop.permute.xlu0 %337 }
 0x149   : > { %v281_v29 = vpop.permute.xlu2 %280 }
 0x14a   : > { %291 = vst.msk [vmem:[#allocation2 + $0x10] sm:$0xff] %vm288_vm1, %v281_v29 }
 0x150   : > { %v391_v33 = vpop.permute.xlu0 %390 }
 0x151   : > { %v277_v31 = vpop.permute.xlu1 %276  ;;  %v283_v32 = vpop.permute.xlu2 %282 }
 0x152   : > { %289 = vst.msk [vmem:[#allocation2] sm:$0xff] %vm288_vm1, %v277_v31 }
 0x153   : > { %292 = vst.msk [vmem:[#allocation2 + $0x18] sm:$0xff] %vm288_vm1, %v283_v32 }
 0x154   : > { %347 = vst.msk [vmem:[#allocation2 + $0x18] sm:$0xff] %vm343_vm2, %v338_v30 }
 0x158   : > { %v393_v36 = vpop.permute.xlu0 %392 }
 0x159   : > { %v279_v34 = vpop.permute.xlu1 %278  ;;  %v332_v35 = vpop.permute.xlu2 %331  ;;  %402 = vst.msk [vmem:[#allocation2 + $0x18] sm:$0xff] %vm398_vm3, %v393_v36 }
 0x15a   : > { %290 = vst.msk [vmem:[#allocation2 + $0x8] sm:$0xff] %vm288_vm1, %v279_v34  ;;  %v2063_v34 = vld [vmem:[%s2562_s30 + $0x50] sm:$0xff] }
 0x15b   : > { %344 = vst.msk [vmem:[#allocation2] sm:$0xff] %vm343_vm2, %v332_v35 }
 0x161   : > { %v387_v37 = vpop.permute.xlu1 %386  ;;  %v334_v38 = vpop.permute.xlu2 %333 }
 0x162   : > { %399 = vst.msk [vmem:[#allocation2] sm:$0xff] %vm398_vm3, %v387_v37 }
 0x163   : > { %345 = vst.msk [vmem:[#allocation2 + $0x8] sm:$0xff] %vm343_vm2, %v334_v38 }
 0x169   : > { %v336_v39 = vpop.permute.xlu2 %335 }
 0x16a   : > { %346 = vst.msk [vmem:[#allocation2 + $0x10] sm:$0xff] %vm343_vm2, %v336_v39 }
 0x16b   : > { %401 = vst.msk [vmem:[#allocation2 + $0x10] sm:$0xff] %vm398_vm3, %v391_v33 }
 0x171   : > { %v389_v40 = vpop.permute.xlu2 %388 }
 0x172   : > { %400 = vst.msk [vmem:[#allocation2 + $0x8] sm:$0xff] %vm398_vm3, %v389_v40 }
 0x179   : > { %v405_v41 = vld [vmem:[#allocation2 + $0x1] ss:$8 sm:$0xf]  ;;  %v413_v42 = vld [vmem:[#allocation2 + $0x5] ss:$8 sm:$0xf] }
 0x17a   : > { %v2331_v43 = vpack.i.bf16 %v413_v42, %v405_v41  ;;  %v409_v44 = vld [vmem:[#allocation2 + $0x3] ss:$8 sm:$0xf]  ;;  %v417_v45 = vld [vmem:[#allocation2 + $0x7] ss:$8 sm:$0xf] }
 0x17b   : > { %v2336_v46 = vpack.i.bf16 %v417_v45, %v409_v44  ;;  %v407_v47 = vld [vmem:[#allocation2 + $0x2] ss:$8 sm:$0xf]  ;;  %v2603_v48 = vld [vmem:[#allocation2 + $0x4] ss:$8 sm:$0xf] }
 0x17c   : > { %2332 = vrot.lane.b32.xlu1 %v2331_v43, %s2478_s7  ;;  %v415_v49 = vld [vmem:[#allocation2 + $0x6] ss:$8 sm:$0xf]  ;;  %v2605_v51 = vld [vmem:[#allocation2] ss:$8 sm:$0xf] }
 0x17d   : > { %v2341_v56 = vpack.i.bf16 %v415_v49, %v407_v47 }
 0x184   : > { %2337 = vrot.lane.b32.xlu1 %v2336_v46, %s2479_s8 }
 0x1ac   : > { %v632_v50 = vpop.trf.xlu0 }
 0x1ad   : > { %648 = vst.msk [vmem:[#allocation2] sm:$0xff] %vm233_vm0, %v632_v50 }
 0x1b4   : > { %v633_v52 = vpop.trf.xlu0 }
 0x1b5   : > { %649 = vst.msk [vmem:[#allocation2 + $0x8] sm:$0xff] %vm233_vm0, %v633_v52 }
 0x1bc   : > { %v634_v53 = vpop.trf.xlu0 }
 0x1bd   : > { %650 = vst.msk [vmem:[#allocation2 + $0x10] sm:$0xff] %vm233_vm0, %v634_v53  ;;  %v2064_v53 = vld [vmem:[%s2562_s30 + $0x70] sm:$0xff] }
 0x1be   : > { %690 = vrot.lane.b32.xlu2 %v670_v23, %s2477_s6 }
 0x1c4   : > { %v635_v54 = vpop.trf.xlu0 }
 0x1c5   : > { %651 = vst.msk [vmem:[#allocation2 + $0x18] sm:$0xff] %vm233_vm0, %v635_v54 }
 0x1c6   : > { %692 = vrot.lane.b32.xlu2 %v671_v24, %s2477_s6 }
 0x1cc   : > { %v724_v55 = vpop.trf.xlu0 }
 0x1ce   : > { %694 = vrot.lane.b32.xlu2 %v672_v26, %s2477_s6  ;;  %2342 = vrot.lane.b32.xlu0 %v2341_v56, %s2480_s9 }
 0x1d4   : > { %v725_v57 = vpop.trf.xlu0 }
 0x1d6   : > { %696 = vrot.lane.b32.xlu2 %v673_v28, %s2477_s6  ;;  %v778_v58 = vpop.trf.xlu2  ;;  %v2132_v28 = vld [vmem:[%s2562_s30 + $0x78] sm:$0xff] }
 0x1d7   : > { %798 = vrot.lane.b32.xlu0 %v778_v58, %s2476_s5  ;;  %v2391_v58 = vld [vmem:[%s3034_s2] ss:$0 sm:$0xff] }
 0x1dc   : > { %v726_v59 = vpop.trf.xlu0 }
 0x1dd   : > { %748 = vrot.lane.b32.xlu1 %v726_v59, %s2475_s4 }
 0x1de   : > { %v779_v60 = vpop.trf.xlu2  ;;  %744 = vrot.lane.b32.xlu2 %v724_v55, %s2475_s4 }
 0x1e4   : > { %v727_v62 = vpop.trf.xlu0 }
 0x1e6   : > { %v780_v61 = vpop.trf.xlu2  ;;  %746 = vrot.lane.b32.xlu2 %v725_v57, %s2475_s4  ;;  %v2131_v57 = vld [vmem:[%s2562_s30 + $0x58] sm:$0xff] }
 0x1e7   : > { %802 = vrot.lane.b32.xlu1 %v780_v61, %s2476_s5 }
 0x1ec   : > { %v2654_v11 = vpop.trf.xlu0 }
 0x1ee   : > { %v781_v63 = vpop.trf.xlu2  ;;  %750 = vrot.lane.b32.xlu2 %v727_v62, %s2475_s4  ;;  %v2333_v25 = vpop.permute.xlu1 %2332 }
 0x1ef   : > { %804 = vrot.lane.b32.xlu1 %v781_v63, %s2476_s5  ;;  %v2335_v29 = vunpack.i.h.bf16 %v2333_v25  ;;  %v2334_v30 = vunpack.i.l.bf16 %v2333_v25 }
 0x1f1   : > { %v443_v39 = vsel %vm442_vm4, %v2605_v51, %v2334_v30  ;;  %v448_v40 = vsel %vm442_vm4, %v2603_v48, %v2335_v29 }
 0x1f4   : > { %v2672_v19 = vpop.trf.xlu0 }
 0x1f6   : > { %800 = vrot.lane.b32.xlu2 %v779_v60, %s2476_s5  ;;  %v2338_v31 = vpop.permute.xlu1 %2337 }
 0x1f7   : > { %v2340_v37 = vunpack.i.h.bf16 %v2338_v31  ;;  %v2339_v38 = vunpack.i.l.bf16 %v2338_v31 }
 0x1fc   : > { %v1076_v23 = vpop.trf.xlu0 }
 0x204   : > { %v2682_v26 = vpop.trf.xlu0 }
 0x218   : > { %v691_v8 = vpop.permute.xlu2 %690 }
 0x219   : > { %702 = vst.msk [vmem:[#allocation2] sm:$0xff] %vm288_vm1, %v691_v8 }
 0x21c   : > { %1458 = vxpose.xlu2.b32.start.end [1/1] (short) (narrow) %v2130_v12, 32 }
 0x220   : > { %v693_v15 = vpop.permute.xlu2 %692 }
 0x221   : > { %703 = vst.msk [vmem:[#allocation2 + $0x8] sm:$0xff] %vm288_vm1, %v693_v15 }
 0x224   : > { %1020 = vxpose.xlu1.b32.start.end [1/1] (short) (narrow) %v2061_v18, 32 }
 0x228   : > { %v695_v22 = vpop.permute.xlu2 %694 }
 0x229   : > { %704 = vst.msk [vmem:[#allocation2 + $0x10] sm:$0xff] %vm288_vm1, %v695_v22 }
 0x230   : > { %v697_v24 = vpop.permute.xlu2 %696 }
 0x231   : > { %705 = vst.msk [vmem:[#allocation2 + $0x18] sm:$0xff] %vm288_vm1, %v697_v24 }
 0x238   : > { %v745_v27 = vpop.permute.xlu2 %744 }
 0x239   : > { %756 = vst.msk [vmem:[#allocation2] sm:$0xff] %vm343_vm2, %v745_v27 }
 0x23c   : > { %1566 = vxpose.xlu2.b32.start.end [1/1] (short) (narrow) %v2132_v28, 32 }
 0x240   : > { %v747_v32 = vpop.permute.xlu2 %746  ;;  %v2343_v33 = vpop.permute.xlu0 %2342 }
 0x241   : > { %757 = vst.msk [vmem:[#allocation2 + $0x8] sm:$0xff] %vm343_vm2, %v747_v32  ;;  %v2345_v35 = vunpack.i.h.bf16 %v2343_v33  ;;  %v2344_v36 = vunpack.i.l.bf16 %v2343_v33 }
 0x243   : > { %v445_v41 = vsel %vm444_vm5, %v443_v39, %v2344_v36  ;;  %v449_v42 = vsel %vm444_vm5, %v448_v40, %v2345_v35  ;;  %v2226_v35 = vld [vmem:[%s3033_s1 + $0x38] sm:$0xff]  ;;  %v2224_v39 = vld [vmem:[%s3033_s1 + $0x28] sm:$0xff] }
 0x244   : > { %1112 = vxpose.xlu1.b32.start.end [1/1] (short) (narrow) %v2063_v34, 32  ;;  %v447_v43 = vsel %vm446_vm6, %v445_v41, %v2339_v38  ;;  %v450_v44 = vsel %vm446_vm6, %v449_v42, %v2340_v37  ;;  %v2234_v36 = vld [vmem:[%s3033_s1 + $0x78] sm:$0xff]  ;;  %986 = vmatpush.bf16.msra.mxu2 %v2226_v35  ;;  %v2225_v37 = vld [vmem:[%s3033_s1 + $0x30] sm:$0xff]  ;;  %v2232_v40 = vld [vmem:[%s3033_s1 + $0x68] sm:$0xff] }
 0x245   : > { %v451_v45 = vpack.c.bf16 %v447_v43, %v447_v43  ;;  %v452_v46 = vpack.c.bf16 %v450_v44, %v450_v44  ;;  %999 = vmatpush.bf16.msra.mxu3 %v2234_v36  ;;  %v2233_v38 = vld [vmem:[%s3033_s1 + $0x70] sm:$0xff]  ;;  %v2223_v43 = vld [vmem:[%s3033_s1 + $0x20] sm:$0xff] }
 0x246   : > { %v2231_v44 = vld [vmem:[%s3033_s1 + $0x60] sm:$0xff] }
 0x247   : > { %593 = vmatmul.bf16.vlgmr.msra.gmra.mxu0 %v451_v45  ;;  %606 = vmatmul.bf16.vlgmr.msra.gmra.mxu1 %v452_v46  ;;  %v2222_v45 = vld [vmem:[%s3033_s1 + $0x18] sm:$0xff] }
 0x248   : > { %v751_v47 = vpop.permute.xlu2 %750  ;;  %987 = vmatpush.bf16.msra.mxu2 %v2225_v37  ;;  %v2230_v46 = vld [vmem:[%s3033_s1 + $0x58] sm:$0xff]  ;;  %v2392_v37 = vld [vmem:[%s3034_s2] ss:$0 sm:$0xff] }
 0x249   : > { %759 = vst.msk [vmem:[#allocation2 + $0x18] sm:$0xff] %vm343_vm2, %v751_v47  ;;  %v799_v49 = vpop.permute.xlu0 %798  ;;  %1000 = vmatpush.bf16.msra.mxu3 %v2233_v38  ;;  %v2221_v47 = vld [vmem:[%s3033_s1 + $0x10] sm:$0xff] }
 0x24a   : > { %810 = vst.msk [vmem:[#allocation2] sm:$0xff] %vm398_vm3, %v799_v49 }
 0x24c   : > { %988 = vmatpush.bf16.msra.mxu2 %v2224_v39 }
 0x24d   : > { %1001 = vmatpush.bf16.msra.mxu3 %v2232_v40 }
 0x24f   : > { %v749_v50 = vpop.permute.xlu1 %748 }
 0x250   : > { %v801_v48 = vpop.permute.xlu2 %800  ;;  %758 = vst.msk [vmem:[#allocation2 + $0x10] sm:$0xff] %vm343_vm2, %v749_v50  ;;  %989 = vmatpush.bf16.msra.mxu2 %v2223_v43 }
 0x251   : > { %811 = vst.msk [vmem:[#allocation2 + $0x8] sm:$0xff] %vm398_vm3, %v801_v48  ;;  %1002 = vmatpush.bf16.msra.mxu3 %v2231_v44  ;;  %v2229_v48 = vld [vmem:[%s3033_s1 + $0x50] sm:$0xff] }
 0x254   : > { %990 = vmatpush.bf16.msra.mxu2 %v2222_v45 }
 0x255   : > { %1003 = vmatpush.bf16.msra.mxu3 %v2230_v46 }
 0x258   : > { %991 = vmatpush.bf16.msra.mxu2 %v2221_v47 }
 0x259   : > { %v803_v51 = vpop.permute.xlu1 %802  ;;  %1004 = vmatpush.bf16.msra.mxu3 %v2229_v48 }
 0x25a   : > { %812 = vst.msk [vmem:[#allocation2 + $0x10] sm:$0xff] %vm398_vm3, %v803_v51  ;;  %v2129_v51 = vld [vmem:[%s2562_s30 + $0x18] sm:$0xff] }
 0x261   : > { %v805_v52 = vpop.permute.xlu1 %804 }
 0x262   : > { %813 = vst.msk [vmem:[#allocation2 + $0x18] sm:$0xff] %vm398_vm3, %v805_v52  ;;  %v2220_v52 = vld [vmem:[%s3033_s1 + $0x8] sm:$0xff] }
 0x263   : > { %992 = vmatpush.bf16.msra.mxu2 %v2220_v52  ;;  %v2266_v52 = vld [vmem:[%s3033_s1 + $0x78] sm:$0xff] }
 0x264   : > { %1166 = vxpose.xlu1.b32.start.end [1/1] (short) (narrow) %v2064_v53, 32  ;;  %v2228_v53 = vld [vmem:[%s3033_s1 + $0x48] sm:$0xff] }
 0x265   : > { %1005 = vmatpush.bf16.msra.mxu3 %v2228_v53  ;;  %v2257_v53 = vld [vmem:[%s3033_s1 + $0x30] sm:$0xff] }
 0x269   : > { %v817_v54 = vld [vmem:[#allocation2 + $0x3] ss:$8 sm:$0xf]  ;;  %v821_v55 = vld [vmem:[#allocation2 + $0x7] ss:$8 sm:$0xf] }
 0x26a   : > { %v2346_v56 = vpack.i.bf16 %v821_v55, %v817_v54  ;;  %v815_v61 = vld [vmem:[#allocation2 + $0x1] ss:$8 sm:$0xf]  ;;  %v816_v62 = vld [vmem:[#allocation2 + $0x2] ss:$8 sm:$0xf] }
 0x26b   : > { %v2716_v0 = vld [vmem:[#allocation2 + $0x4] ss:$8 sm:$0xf]  ;;  %v819_v1 = vld [vmem:[#allocation2 + $0x5] ss:$8 sm:$0xf] }
 0x26c   : > { %2347 = vrot.lane.b32.xlu0 %v2346_v56, %s2479_s8  ;;  %v820_v2 = vld [vmem:[#allocation2 + $0x6] ss:$8 sm:$0xf]  ;;  %v2718_v6 = vld [vmem:[#allocation2] ss:$8 sm:$0xf] }
 0x26d   : > { %v2356_v22 = vpack.i.bf16 %v820_v2, %v816_v62  ;;  %v2219_v54 = vld [vmem:[%s3033_s1] sm:$0xff] }
 0x26e   : > { %v2227_v55 = vld [vmem:[%s3033_s1 + $0x40] sm:$0xff]  ;;  %993 = vmatpush.bf16.msra.mxu2 %v2219_v54  ;;  %v2265_v54 = vld [vmem:[%s3033_s1 + $0x70] sm:$0xff] }
 0x26f   : > { %1006 = vmatpush.bf16.msra.mxu3 %v2227_v55  ;;  %v2242_v55 = vld [vmem:[%s3033_s1 + $0x38] sm:$0xff] }
 0x270   : > { %1390 = vmatpush.bf16.msrb.mxu0 %v2242_v55 }
 0x273   : > { %1803 = vmatpush.bf16.msrb.mxu3 %v2266_v52 }
 0x274   : > { %1098 = vrot.lane.b32.xlu0 %v1076_v23, %s2477_s6 }
 0x277   : > { %1804 = vmatpush.bf16.msrb.mxu3 %v2265_v54 }
 0x284   : > { %1512 = vxpose.xlu1.b32.start.end [1/1] (short) (narrow) %v2131_v57, 32 }
 0x2b5   : > { %v1474_v5 = vpop.trf.xlu2 }
 0x2bd   : > { %1094 = vrot.lane.b32.xlu2 %v2654_v11, %s2477_s6  ;;  %v1475_v11 = vpop.trf.xlu2 }
 0x2c4   : > { %v594_v59 = vpop.f32.mrf.mxu0  ;;  %v607_v60 = vpop.f32.mrf.mxu1 }
 0x2c5   : > { %1096 = vrot.lane.b32.xlu2 %v2672_v19, %s2477_s6  ;;  %v595_v63 = vadd.f32 %v2391_v58, %v594_v59  ;;  %v1476_v13 = vpop.trf.xlu2  ;;  %v2351_v19 = vpack.i.bf16 %v819_v1, %v815_v61 }
 0x2c7   : > { %v608_v3 = vadd.f32 %v607_v60, %v595_v63 }
 0x2c8   : > { %v1036_v4 = vpop.trf.xlu1 }
 0x2c9   : > { %1052 = vst.msk [vmem:[#allocation2] sm:$0xff] %vm233_vm0, %v1036_v4  ;;  %v611_v7 = vpack.c.bf16 %v608_v3, %v608_v3 }
 0x2cb   : > { %613 = vst.msk [vmem:[%s2721_s26] sm:$0x3] %vm612_vm7, %v611_v7 }
 0x2cc   : > { %v596_v8 = vpop.f32.mrf.mxu0  ;;  %v609_v9 = vpop.f32.mrf.mxu1 }
 0x2cd   : > { %1100 = vrot.lane.b32.xlu2 %v2682_v26, %s2477_s6  ;;  %v1477_v15 = vpop.trf.xlu2 }
 0x2d0   : > { %v1037_v10 = vpop.trf.xlu1 }
 0x2d1   : > { %1053 = vst.msk [vmem:[#allocation2 + $0x8] sm:$0xff] %vm233_vm0, %v1037_v10 }
 0x2d5   : > { %v2731_v17 = vpop.trf.xlu2 }
 0x2d8   : > { %v1038_v12 = vpop.trf.xlu1 }
 0x2d9   : > { %1054 = vst.msk [vmem:[#allocation2 + $0x10] sm:$0xff] %vm233_vm0, %v1038_v12 }
 0x2dd   : > { %v2736_v21 = vpop.trf.xlu2 }
 0x2de   : > { %v2749_v32 = vpop.permute.xlu0 %2347 }
 0x2df   : > { %v2350_v4 = vunpack.i.h.bf16 %v2749_v32 }
 0x2e0   : > { %v1039_v14 = vpop.trf.xlu1 }
 0x2e1   : > { %1055 = vst.msk [vmem:[#allocation2 + $0x18] sm:$0xff] %vm233_vm0, %v1039_v14 }
 0x2e5   : > { %v1584_v24 = vpop.trf.xlu2 }
 0x2e6   : > { %v1099_v34 = vpop.permute.xlu0 %1098 }
 0x2e7   : > { %1108 = vst.msk [vmem:[#allocation2 + $0x10] sm:$0xff] %vm288_vm1, %v1099_v34 }
 0x2e8   : > { %v1128_v16 = vpop.trf.xlu1 }
 0x2e9   : > { %1148 = vrot.lane.b32.xlu2 %v1128_v16, %s2475_s4 }
 0x2ed   : > { %v2741_v26 = vpop.trf.xlu2 }
 0x2f0   : > { %v1129_v18 = vpop.trf.xlu1 }
 0x2f1   : > { %1150 = vrot.lane.b32.xlu2 %v1129_v18, %s2475_s4 }
 0x2f6   : > { %2352 = vrot.lane.b32.xlu1 %v2351_v19, %s2478_s7 }
 0x2f8   : > { %v1130_v20 = vpop.trf.xlu1 }
 0x2f9   : > { %1152 = vrot.lane.b32.xlu2 %v1130_v20, %s2475_s4 }
 0x2fe   : > { %2357 = vrot.lane.b32.xlu1 %v2356_v22, %s2480_s9 }
 0x300   : > { %v1131_v23 = vpop.trf.xlu1 }
 0x301   : > { %1154 = vrot.lane.b32.xlu2 %v1131_v23, %s2475_s4 }
 0x308   : > { %v1182_v25 = vpop.trf.xlu1 }
 0x309   : > { %1202 = vrot.lane.b32.xlu2 %v1182_v25, %s2476_s5 }
 0x310   : > { %v1183_v27 = vpop.trf.xlu1 }
 0x311   : > { %1204 = vrot.lane.b32.xlu1 %v1183_v27, %s2476_s5 }
 0x317   : > { %v1095_v28 = vpop.permute.xlu2 %1094 }
 0x318   : > { %v1184_v29 = vpop.trf.xlu1  ;;  %1106 = vst.msk [vmem:[#allocation2] sm:$0xff] %vm288_vm1, %v1095_v28 }
 0x319   : > { %1606 = vrot.lane.b32.xlu1 %v1584_v24, %s2476_s5  ;;  %1206 = vrot.lane.b32.xlu2 %v1184_v29, %s2476_s5 }
 0x31f   : > { %v1097_v30 = vpop.permute.xlu2 %1096 }
 0x320   : > { %v1185_v31 = vpop.trf.xlu1  ;;  %1107 = vst.msk [vmem:[#allocation2 + $0x8] sm:$0xff] %vm288_vm1, %v1097_v30 }
 0x321   : > { %1208 = vrot.lane.b32.xlu0 %v1185_v31, %s2476_s5 }
 0x327   : > { %v1101_v33 = vpop.permute.xlu2 %1100 }
 0x328   : > { %1109 = vst.msk [vmem:[#allocation2 + $0x18] sm:$0xff] %vm288_vm1, %v1101_v33  ;;  %v1528_v41 = vpop.trf.xlu1 }
 0x329   : > { %1494 = vrot.lane.b32.xlu0 %v1474_v5, %s2477_s6  ;;  %v2349_v5 = vunpack.i.l.bf16 %v2749_v32 }
 0x330   : > { %v1529_v49 = vpop.trf.xlu1 }
 0x331   : > { %1496 = vrot.lane.b32.xlu0 %v1475_v11, %s2477_s6 }
 0x338   : > { %v1530_v57 = vpop.trf.xlu1 }
 0x339   : > { %1498 = vrot.lane.b32.xlu0 %v1476_v13, %s2477_s6 }
 0x340   : > { %v1531_v59 = vpop.trf.xlu1 }
 0x341   : > { %1500 = vrot.lane.b32.xlu0 %v1477_v15, %s2477_s6  ;;  %s1822_s6 = scalar_lea.sflag [#allocation4], %s186_s21 }
 0x343   : > { %v1149_v42 = vpop.permute.xlu2 %1148 }
 0x344   : > { %1160 = vst.msk [vmem:[#allocation2] sm:$0xff] %vm343_vm2, %v1149_v42 }
 0x349   : > { %1548 = vrot.lane.b32.xlu0 %v1528_v41, %s2475_s4 }
 0x34b   : > { %v1151_v50 = vpop.permute.xlu2 %1150 }
 0x34c   : > { %1161 = vst.msk [vmem:[#allocation2 + $0x8] sm:$0xff] %vm343_vm2, %v1151_v50 }
 0x34e   : > { %1420 = vxpose.xlu1.b32.start.end [1/1] (short) (narrow) %v2129_v51, 32  ;;  %v2258_v51 = vld [vmem:[%s3033_s1 + $0x38] sm:$0xff] }
 0x34f   : > { %1790 = vmatpush.bf16.msrb.mxu2 %v2258_v51 }
 0x351   : > { %1550 = vrot.lane.b32.xlu0 %v1529_v49, %s2475_s4 }
 0x353   : > { %v1153_v56 = vpop.permute.xlu2 %1152  ;;  %1791 = vmatpush.bf16.msrb.mxu2 %v2257_v53 }
 0x354   : > { %1162 = vst.msk [vmem:[#allocation2 + $0x10] sm:$0xff] %vm343_vm2, %v1153_v56  ;;  %v2250_v56 = vld [vmem:[%s3033_s1 + $0x78] sm:$0xff] }
 0x355   : > { %1403 = vmatpush.bf16.msrb.mxu1 %v2250_v56 }
 0x359   : > { %1552 = vrot.lane.b32.xlu0 %v1530_v57, %s2475_s4 }
 0x35b   : > { %v1155_v58 = vpop.permute.xlu2 %1154 }
 0x35c   : > { %1163 = vst.msk [vmem:[#allocation2 + $0x18] sm:$0xff] %vm343_vm2, %v1155_v58 }
 0x361   : > { %1554 = vrot.lane.b32.xlu0 %v1531_v59, %s2475_s4 }
 0x363   : > { %v1203_v60 = vpop.permute.xlu2 %1202 }
 0x364   : > { %1214 = vst.msk [vmem:[#allocation2] sm:$0xff] %vm398_vm3, %v1203_v60  ;;  %v2256_v60 = vld [vmem:[%s3033_s1 + $0x28] sm:$0xff] }
 0x365   : > { %1792 = vmatpush.bf16.msrb.mxu2 %v2256_v60 }
 0x368   : > { %v2353_v61 = vpop.permute.xlu1 %2352 }
 0x369   : > { %1602 = vrot.lane.b32.xlu0 %v2731_v17, %s2476_s5  ;;  %v2355_v62 = vunpack.i.h.bf16 %v2353_v61  ;;  %v2354_v63 = vunpack.i.l.bf16 %v2353_v61  ;;  %v2264_v61 = vld [vmem:[%s3033_s1 + $0x68] sm:$0xff] }
 0x36a   : > { %1805 = vmatpush.bf16.msrb.mxu3 %v2264_v61 }
 0x36b   : > { %v846_v7 = vsel %vm442_vm4, %v2718_v6, %v2354_v63  ;;  %v849_v8 = vsel %vm442_vm4, %v2716_v0, %v2355_v62 }
 0x370   : > { %v2358_v1 = vpop.permute.xlu1 %2357 }
 0x371   : > { %v2360_v2 = vunpack.i.h.bf16 %v2358_v1  ;;  %v2359_v3 = vunpack.i.l.bf16 %v2358_v1  ;;  %1604 = vrot.lane.b32.xlu0 %v2736_v21, %s2476_s5 }
 0x373   : > { %v847_v9 = vsel %vm444_vm5, %v846_v7, %v2359_v3  ;;  %v850_v10 = vsel %vm444_vm5, %v849_v8, %v2360_v2  ;;  %v1207_v13 = vpop.permute.xlu2 %1206  ;;  %v2255_v7 = vld [vmem:[%s3033_s1 + $0x20] sm:$0xff] }
 0x374   : > { %v848_v11 = vsel %vm446_vm6, %v847_v9, %v2349_v5  ;;  %v851_v12 = vsel %vm446_vm6, %v850_v10, %v2350_v4  ;;  %1216 = vst.msk [vmem:[#allocation2 + $0x10] sm:$0xff] %vm398_vm3, %v1207_v13  ;;  %v2263_v8 = vld [vmem:[%s3033_s1 + $0x60] sm:$0xff]  ;;  %v2241_v9 = vld [vmem:[%s3033_s1 + $0x30] sm:$0xff]  ;;  %1793 = vmatpush.bf16.msrb.mxu2 %v2255_v7  ;;  %v2240_v13 = vld [vmem:[%s3033_s1 + $0x28] sm:$0xff] }
 0x375   : > { %v852_v14 = vpack.c.bf16 %v848_v11, %v848_v11  ;;  %v853_v15 = vpack.c.bf16 %v851_v12, %v851_v12  ;;  %v2249_v10 = vld [vmem:[%s3033_s1 + $0x70] sm:$0xff]  ;;  %1806 = vmatpush.bf16.msrb.mxu3 %v2263_v8  ;;  %v2254_v11 = vld [vmem:[%s3033_s1 + $0x18] sm:$0xff]  ;;  %1391 = vmatpush.bf16.msrb.mxu0 %v2241_v9 }
 0x376   : > { %v2262_v12 = vld [vmem:[%s3033_s1 + $0x58] sm:$0xff]  ;;  %1404 = vmatpush.bf16.msrb.mxu1 %v2249_v10 }
 0x377   : > { %994 = vmatmul.bf16.vlgmr.msra.gmra.mxu2 %v852_v14  ;;  %1007 = vmatmul.bf16.vlgmr.msra.gmra.mxu3 %v853_v15  ;;  %v2248_v14 = vld [vmem:[%s3033_s1 + $0x68] sm:$0xff]  ;;  %v2253_v15 = vld [vmem:[%s3033_s1 + $0x10] sm:$0xff] }
 0x378   : > { %1794 = vmatpush.bf16.msrb.mxu2 %v2254_v11 }
 0x379   : > { %1608 = vrot.lane.b32.xlu0 %v2741_v26, %s2476_s5  ;;  %1807 = vmatpush.bf16.msrb.mxu3 %v2262_v12 }
 0x37a   : > { %1392 = vmatpush.bf16.msrb.mxu0 %v2240_v13  ;;  %1405 = vmatpush.bf16.msrb.mxu1 %v2248_v14 }
 0x37c   : > { %1795 = vmatpush.bf16.msrb.mxu2 %v2253_v15 }
 0x383   : > { %v1205_v6 = vpop.permute.xlu1 %1204 }
 0x384   : > { %1215 = vst.msk [vmem:[#allocation2 + $0x8] sm:$0xff] %vm398_vm3, %v1205_v6  ;;  %v2261_v6 = vld [vmem:[%s3033_s1 + $0x50] sm:$0xff] }
 0x385   : > { %1808 = vmatpush.bf16.msrb.mxu3 %v2261_v6 }
 0x38b   : > { %v1607_v29 = vpop.permute.xlu1 %1606 }
 0x393   : > { %v1209_v0 = vpop.permute.xlu0 %1208 }
 0x394   : > { %1217 = vst.msk [vmem:[#allocation2 + $0x18] sm:$0xff] %vm398_vm3, %v1209_v0  ;;  %v2239_v0 = vld [vmem:[%s3033_s1 + $0x20] sm:$0xff] }
 0x395   : > { %1393 = vmatpush.bf16.msrb.mxu0 %v2239_v0 }
 0x39b   : > { %v1219_v16 = vld [vmem:[#allocation2 + $0x1] ss:$8 sm:$0xf]  ;;  %v1223_v17 = vld [vmem:[#allocation2 + $0x5] ss:$8 sm:$0xf]  ;;  %v1495_v21 = vpop.permute.xlu0 %1494 }
 0x39c   : > { %v2376_v18 = vpack.i.bf16 %v1223_v17, %v1219_v16  ;;  %v1221_v19 = vld [vmem:[#allocation2 + $0x3] ss:$8 sm:$0xf]  ;;  %v1225_v20 = vld [vmem:[#allocation2 + $0x7] ss:$8 sm:$0xf] }
 0x39d   : > { %v2386_v22 = vpack.i.bf16 %v1225_v20, %v1221_v19  ;;  %v2836_v31 = vld [vmem:[#allocation2 + $0x2] ss:$8 sm:$0xf]  ;;  %v2838_v32 = vld [vmem:[#allocation2 + $0x6] ss:$8 sm:$0xf] }
 0x39e   : > { %2377 = vrot.lane.b32.xlu2 %v2376_v18, %s2478_s7  ;;  %v2840_v34 = vld [vmem:[#allocation2 + $0x4] ss:$8 sm:$0xf]  ;;  %v2842_v35 = vld [vmem:[#allocation2] ss:$8 sm:$0xf]  ;;  %v2381_v5 = vpack.i.bf16 %v2838_v32, %v2836_v31 }
 0x39f   : > { %v2247_v16 = vld [vmem:[%s3033_s1 + $0x60] sm:$0xff]  ;;  %v2252_v17 = vld [vmem:[%s3033_s1 + $0x8] sm:$0xff]  ;;  %v2238_v19 = vld [vmem:[%s3033_s1 + $0x18] sm:$0xff] }
 0x3a0   : > { %v2260_v18 = vld [vmem:[%s3033_s1 + $0x48] sm:$0xff]  ;;  %1406 = vmatpush.bf16.msrb.mxu1 %v2247_v16  ;;  %v2246_v20 = vld [vmem:[%s3033_s1 + $0x58] sm:$0xff]  ;;  %1796 = vmatpush.bf16.msrb.mxu2 %v2252_v17 }
 0x3a1   : > { %1809 = vmatpush.bf16.msrb.mxu3 %v2260_v18  ;;  %1394 = vmatpush.bf16.msrb.mxu0 %v2238_v19 }
 0x3a3   : > { %v1497_v23 = vpop.permute.xlu0 %1496 }
 0x3a4   : > { %1407 = vmatpush.bf16.msrb.mxu1 %v2246_v20 }
 0x3a6   : > { %2387 = vrot.lane.b32.xlu2 %v2386_v22, %s2479_s8  ;;  %v2259_v22 = vld [vmem:[%s3033_s1 + $0x40] sm:$0xff] }
 0x3a7   : > { %1810 = vmatpush.bf16.msrb.mxu3 %v2259_v22 }
 0x3ab   : > { %v1499_v24 = vpop.permute.xlu0 %1498 }
 0x3b3   : > { %v1501_v25 = vpop.permute.xlu0 %1500 }
 0x3bb   : > { %v1549_v26 = vpop.permute.xlu0 %1548 }
 0x3c3   : > { %v1551_v27 = vpop.permute.xlu0 %1550 }
 0x3cb   : > { %v1553_v28 = vpop.permute.xlu0 %1552 }
 0x3d3   : > { %v1555_v30 = vpop.permute.xlu0 %1554 }
 0x3db   : > { %v1603_v36 = vpop.permute.xlu0 %1602 }
 0x3e3   : > { %v1605_v43 = vpop.permute.xlu0 %1604 }
 0x3eb   : > { %v1609_v50 = vpop.permute.xlu0 %1608 }
 0x3f2   : > { %v1436_v33 = vpop.trf.xlu1 }
 0x3f3   : > { %1452 = vst.msk [vmem:[#allocation2] sm:$0xff] %vm233_vm0, %v1436_v33 }
 0x3f4   : > { %1506 = vst.msk [vmem:[#allocation2] sm:$0xff] %vm288_vm1, %v1495_v21  ;;  %v2251_v21 = vld [vmem:[%s3033_s1] sm:$0xff] }
 0x3f5   : > { %1560 = vst.msk [vmem:[#allocation2] sm:$0xff] %vm343_vm2, %v1549_v26  ;;  %1797 = vmatpush.bf16.msrb.mxu2 %v2251_v21  ;;  %v2244_v26 = vld [vmem:[%s3033_s1 + $0x48] sm:$0xff] }
 0x3f6   : > { %1614 = vst.msk [vmem:[#allocation2] sm:$0xff] %vm398_vm3, %v1603_v36 }
 0x3f8   : > { %v2378_v31 = vpop.permute.xlu2 %2377 }
 0x3f9   : > { %v2380_v51 = vunpack.i.h.bf16 %v2378_v31  ;;  %v2379_v52 = vunpack.i.l.bf16 %v2378_v31 }
 0x3fa   : > { %v995_v38 = vpop.f32.mrf.mxu2  ;;  %v1008_v39 = vpop.f32.mrf.mxu3 }
 0x3fb   : > { %v996_v40 = vadd.f32 %v2392_v37, %v995_v38  ;;  %v1437_v41 = vpop.trf.xlu1 }
 0x3fc   : > { %1453 = vst.msk [vmem:[#allocation2 + $0x8] sm:$0xff] %vm233_vm0, %v1437_v41 }
 0x3fd   : > { %v1009_v42 = vadd.f32 %v1008_v39, %v996_v40  ;;  %1507 = vst.msk [vmem:[#allocation2 + $0x8] sm:$0xff] %vm288_vm1, %v1497_v23  ;;  %v2237_v23 = vld [vmem:[%s3033_s1 + $0x10] sm:$0xff] }
 0x3fe   : > { %1561 = vst.msk [vmem:[#allocation2 + $0x8] sm:$0xff] %vm343_vm2, %v1551_v27  ;;  %1395 = vmatpush.bf16.msrb.mxu0 %v2237_v23  ;;  %v2235_v27 = vld [vmem:[%s3033_s1] sm:$0xff] }
 0x3ff   : > { %v1012_v44 = vpack.c.bf16 %v1009_v42, %v1009_v42  ;;  %1615 = vst.msk [vmem:[#allocation2 + $0x8] sm:$0xff] %vm398_vm3, %v1605_v43 }
 0x400   : > { %v2388_v53 = vpop.permute.xlu2 %2387 }
 0x401   : > { %v1014_v45 = vrot.slane %v1012_v44, 6  ;;  %v2389_v60 = vunpack.i.l.bf16 %v2388_v53 }
 0x402   : > { %v997_v46 = vpop.f32.mrf.mxu2  ;;  %v1010_v47 = vpop.f32.mrf.mxu3 }
 0x403   : > { %1017 = vst.msk [vmem:[%s2721_s26] sm:$0xc] %vm1016_vm8, %v1014_v45  ;;  %v1438_v49 = vpop.trf.xlu1 }
 0x404   : > { %1454 = vst.msk [vmem:[#allocation2 + $0x10] sm:$0xff] %vm233_vm0, %v1438_v49 }
 0x405   : > { %1508 = vst.msk [vmem:[#allocation2 + $0x10] sm:$0xff] %vm288_vm1, %v1499_v24  ;;  %v2245_v24 = vld [vmem:[%s3033_s1 + $0x50] sm:$0xff] }
 0x406   : > { %1562 = vst.msk [vmem:[#allocation2 + $0x10] sm:$0xff] %vm343_vm2, %v1553_v28  ;;  %1408 = vmatpush.bf16.msrb.mxu1 %v2245_v24  ;;  %v2243_v28 = vld [vmem:[%s3033_s1 + $0x40] sm:$0xff] }
 0x407   : > { %1616 = vst.msk [vmem:[#allocation2 + $0x10] sm:$0xff] %vm398_vm3, %v1607_v29 }
 0x40a   : > { %1409 = vmatpush.bf16.msrb.mxu1 %v2244_v26 }
 0x40b   : > { %v1439_v48 = vpop.trf.xlu1 }
 0x40c   : > { %1455 = vst.msk [vmem:[#allocation2 + $0x18] sm:$0xff] %vm233_vm0, %v1439_v48 }
 0x40d   : > { %1509 = vst.msk [vmem:[#allocation2 + $0x18] sm:$0xff] %vm288_vm1, %v1501_v25  ;;  %v2236_v25 = vld [vmem:[%s3033_s1 + $0x8] sm:$0xff] }
 0x40e   : > { %1563 = vst.msk [vmem:[#allocation2 + $0x18] sm:$0xff] %vm343_vm2, %v1555_v30  ;;  %1396 = vmatpush.bf16.msrb.mxu0 %v2236_v25  ;;  %1410 = vmatpush.bf16.msrb.mxu1 %v2243_v28 }
 0x40f   : > { %1617 = vst.msk [vmem:[#allocation2 + $0x18] sm:$0xff] %vm398_vm3, %v1609_v50 }
 0x412   : > { %1397 = vmatpush.bf16.msrb.mxu0 %v2235_v27 }
 0x416   : > { %v1619_v57 = vld [vmem:[#allocation2 + $0x1] ss:$8 sm:$0xf]  ;;  %v1623_v58 = vld [vmem:[#allocation2 + $0x5] ss:$8 sm:$0xf] }
 0x417   : > { %v2361_v59 = vpack.i.bf16 %v1623_v58, %v1619_v57  ;;  %v1620_v62 = vld [vmem:[#allocation2 + $0x2] ss:$8 sm:$0xf]  ;;  %v1624_v63 = vld [vmem:[#allocation2 + $0x6] ss:$8 sm:$0xf]  ;;  %v1253_v57 = vsel %vm442_vm4, %v2840_v34, %v2380_v51  ;;  %v1250_v58 = vsel %vm442_vm4, %v2842_v35, %v2379_v52 }
 0x418   : > { %v2366_v1 = vpack.i.bf16 %v1624_v63, %v1620_v62  ;;  %v1621_v2 = vld [vmem:[#allocation2 + $0x3] ss:$8 sm:$0xf]  ;;  %v1625_v3 = vld [vmem:[#allocation2 + $0x7] ss:$8 sm:$0xf] }
 0x419   : > { %2362 = vrot.lane.b32.xlu0 %v2361_v59, %s2478_s7  ;;  %v2371_v4 = vpack.i.bf16 %v1625_v3, %v1621_v2  ;;  %v1622_v38 = vld [vmem:[#allocation2 + $0x4] ss:$8 sm:$0xf]  ;;  %v1618_v39 = vld [vmem:[#allocation2] ss:$8 sm:$0xf]  ;;  %v2390_v59 = vunpack.i.h.bf16 %v2388_v53 }
 0x41a   : > { %v2393_v34 = vld [vmem:[%s3034_s2] ss:$0 sm:$0xff] }
 0x421   : > { %2367 = vrot.lane.b32.xlu0 %v2366_v1, %s2480_s9 }
 0x429   : > { %2372 = vrot.lane.b32.xlu0 %v2371_v4, %s2479_s8  ;;  %s2267_s8 = sshll.u32 %s2465_s15, 3 }
 0x42a   : > { %s1835_s27 = scalar_lea.hbm %s3035_s3, %s2267_s8 }
 0x42b   : > { %s1838_s15 = sshll.u32 %s1835_s27, 4  ;;  %s1839_s15 = int_to_ptr.hbm [resolvable:$true] %s1838_s15 }
 0x42c   : > { %s2409_s7 = sshra.s32 %s1839_s15, 4  ;;  %s2410_s7 = int_to_ptr.hbm [resolvable:$true] %s2409_s7 }
 0x42d   : > { %s2411_s29 = scalar_lea.hbm %s2410_s7, 8  ;;  %p2416_p1 = scmp.lt.s32.totalorder %s2410_s7, %s3035_s3 }
 0x42e   : > { %p2412_p12 = scmp.ne.s32.totalorder %s2410_s7, %s2411_s29  ;;  %p2417_p2 = scmp.lt.s32.totalorder %s2415_s11, %s2411_s29 }
 0x430   : > { %p2413_p13 = pnand %p2412_p12, %p2542_p4  ;;  %p2418_p3 = por %p2417_p2, %p2416_p1 }
 0x431   : > { %2382 = vrot.lane.b32.xlu0 %v2381_v5, %s2480_s9  ;;  %v2394_v5 = vld [vmem:[%s3034_s2] ss:$0 sm:$0xff] }
 0x432   : > { %p2414_p0 = pneg %p2413_p13 }
 0x434   : > { %p2419_p5 = pnand %p2418_p3, %p2414_p0 }
 0x48b   : > { %v2363_v29 = vpop.permute.xlu0 %2362 }
 0x48c   : > { %v2365_v32 = vunpack.i.h.bf16 %v2363_v29  ;;  %v2364_v33 = vunpack.i.l.bf16 %v2363_v29 }
 0x48e   : > { %v1653_v41 = vsel %vm442_vm4, %v1622_v38, %v2365_v32  ;;  %v1650_v42 = vsel %vm442_vm4, %v1618_v39, %v2364_v33 }
 0x493   : > { %v2368_v30 = vpop.permute.xlu0 %2367 }
 0x494   : > { %v2370_v36 = vunpack.i.h.bf16 %v2368_v30  ;;  %v2369_v37 = vunpack.i.l.bf16 %v2368_v30 }
 0x496   : > { %v1651_v45 = vsel %vm444_vm5, %v1650_v42, %v2369_v37  ;;  %v1654_v46 = vsel %vm444_vm5, %v1653_v41, %v2370_v36 }
 0x49b   : > { %v2373_v40 = vpop.permute.xlu0 %2372 }
 0x49c   : > { %v2375_v43 = vunpack.i.h.bf16 %v2373_v40  ;;  %v2374_v44 = vunpack.i.l.bf16 %v2373_v40 }
 0x49e   : > { %v1652_v47 = vsel %vm446_vm6, %v1651_v45, %v2374_v44  ;;  %v1655_v49 = vsel %vm446_vm6, %v1654_v46, %v2375_v43 }
 0x49f   : > { %v1656_v48 = vpack.c.bf16 %v1652_v47, %v1652_v47  ;;  %v1657_v50 = vpack.c.bf16 %v1655_v49, %v1655_v49 }
 0x4a1   : > { %1798 = vmatmul.bf16.vlgmr.msrb.gmra.mxu2 %v1656_v48  ;;  %1811 = vmatmul.bf16.vlgmr.msrb.gmra.mxu3 %v1657_v50 }
 0x4a3   : > { %v2383_v54 = vpop.permute.xlu0 %2382 }
 0x4a4   : > { %v2385_v55 = vunpack.i.h.bf16 %v2383_v54  ;;  %v2384_v56 = vunpack.i.l.bf16 %v2383_v54 }
 0x4a6   : > { %v1254_v61 = vsel %vm444_vm5, %v1253_v57, %v2385_v55  ;;  %v1251_v62 = vsel %vm444_vm5, %v1250_v58, %v2384_v56 }
 0x4a7   : > { %v1252_v63 = vsel %vm446_vm6, %v1251_v62, %v2389_v60  ;;  %v1255_v1 = vsel %vm446_vm6, %v1254_v61, %v2390_v59 }
 0x4a8   : > { %v1256_v2 = vpack.c.bf16 %v1252_v63, %v1252_v63  ;;  %v1257_v3 = vpack.c.bf16 %v1255_v1, %v1255_v1 }
 0x4aa   : > { %1398 = vmatmul.bf16.vlgmr.msrb.gmra.mxu0 %v1256_v2  ;;  %1411 = vmatmul.bf16.vlgmr.msrb.gmra.mxu1 %v1257_v3 }
 0x524   : > { %v1799_v35 = vpop.f32.mrf.mxu2  ;;  %v1812_v4 = vpop.f32.mrf.mxu3 }
 0x525   : > { %v1800_v7 = vadd.f32 %v2393_v34, %v1799_v35 }
 0x527   : > { %v1813_v8 = vadd.f32 %v1812_v4, %v1800_v7  ;;  %v1399_v9 = vpop.f32.mrf.mxu0  ;;  %v1412_v10 = vpop.f32.mrf.mxu1 }
 0x528   : > { %v1400_v11 = vadd.f32 %v2394_v5, %v1399_v9 }
 0x529   : > { %v1816_v12 = vpack.c.bf16 %v1813_v8, %v1813_v8 }
 0x52a   : > { %v1413_v13 = vadd.f32 %v1412_v10, %v1400_v11 }
 0x52b   : > { %v1818_v14 = vrot.slane %v1816_v12, 6 }
 0x52c   : > { %v1416_v15 = vpack.c.bf16 %v1413_v13, %v1413_v13  ;;  %v1801_v6 = vpop.f32.mrf.mxu2  ;;  %v1814_v0 = vpop.f32.mrf.mxu3 }
 0x52d   : > { %1820 = vst.msk [vmem:[%s2721_s26 + $0x4] sm:$0xc] %vm1016_vm8, %v1818_v14 }
 0x52e   : > { %1417 = vst.msk [vmem:[%s2721_s26 + $0x4] sm:$0x3] %vm612_vm7, %v1416_v15 }
 0x52f   : > { %v1401_v16 = vpop.f32.mrf.mxu0  ;;  %v1414_v17 = vpop.f32.mrf.mxu1 }
 0x530   : > { %2422 = shalt.err (!%p2419_p5)
}
 0x531   : > { %s2481_s21 = smov 4  }
 0x532   : > { %2268 = dma.vmem_to_hbm [thread:$0]  (%p2542_p4), %s1837_s28, 128, %s1839_s15, %s1822_s6, %s2480_s9, %s2480_s9, %s2481_s21  }
 0x533 PF: > { %p2274_p6 = scmp.ge.s32.totalorder %s2473_s17, 2  ;;  %s1853_s26 = sand.u32 1, %s2453_s12  }
 0x534   : > { %s1854_s5 = scalar_lea.sflag [#allocation4], %s1853_s26 }
 0x535   : > { %p2271_p7 = pnand %p2274_p6, %p2549_p8 }
 0x537   : > { %p2272_p9 = pneg %p2271_p7 }
 0x539   : > { %2448 = dma.done.wait (%p2272_p9), %s1854_s5, 128  }
 0x53a   : > { %2450 = vsyncadd (%p2272_p9), %s1854_s5, 4294967168  ;;  %s16_s17 = sadd.s32 1, %s2473_s17   ;;  %s3038_s12 = smov %s2457_s13 }
 0x53b   : > { %p13_p10 = scmp.ge.s32.totalorder %s16_s17, 4   ;;  %s3039_s13 = smov %s2461_s14 }
 0x53c   : > { %s3040_s14 = smov %s2555_s25  ;;  %s3041_s15 = smov %s2469_s16 }
 0x53d   : > { %s3042_s16 = smov %s3044_s20  ;;  %15 = sbr.rel (!%p13_p10) target bundleno = 4 (0x4), region = 89 }
 0x542   :  { %1860 = vsyncpa [#allocation4], 1 }
 0x543   :  { %1862 = vsyncpa [#allocation4 + $0x1], 1 }

</bundles_post_ra>
